<compile_context>
chip_gen: v6e
topology: v6e:2x2x1
jax: 0.10.0
libtpu: 0.0.40
codegen_flags: <defaults>
</compile_context>

<pallas_src>
import functools

import jax
import jax.numpy as jnp
import numpy as np
from jax.experimental import pallas as pl
from jax.experimental.pallas import tpu as pltpu

INPUT_SIZE = 2
CNN_CHANNELS = [4, 8, 16]
CNN_HIDDEN = 16
LSTM_HIDDEN = 64
COMPRESS_FACTOR = 128  # 4 * 4 * 4 * 2, as computed in the PyTorch __init__
BATCH_TILE = 8         # sublane height of every matmul; one grid step per tile

CONV_CFG = [
    # (C_in, C_out, K, stride, pad, maxpool?)
    (INPUT_SIZE, CNN_CHANNELS[0], 5, 2, 2, True),
    (CNN_CHANNELS[0], CNN_CHANNELS[1], 3, 2, 1, True),
    (CNN_CHANNELS[1], CNN_CHANNELS[2], 3, 2, 1, True),
    (CNN_CHANNELS[2], CNN_HIDDEN, 3, 2, 1, False),
]


# ---------------------------------------------------------------------------
# Single fused kernel: CNN stack + masked 2-layer LSTM + regressor + sigmoid
# ---------------------------------------------------------------------------
def _fused_kernel(maxt_ref, x_ref, lens_ref,
                  m0e_ref, m0o_ref, s0_ref,
                  m1e_ref, m1o_ref, s1_ref,
                  m2e_ref, m2o_ref, s2_ref,
                  m3_ref, s3_ref,
                  wxa_ref, b1a_ref, wrec_ref, wih2_ref, b2_ref,
                  wr_ref, br_ref,
                  out_ref,
                  xp_ref, h1_ref, c1_ref, h2_ref, c2_ref, *, T, H):
    f32 = jnp.float32
    bf16 = jnp.bfloat16
    B = out_ref.shape[0]

    def conv_pool_relu(h, me_ref, mo_ref, s_ref):
        # Conv1d(+BN scale) with MaxPool1d(2,2) folded in: relu/max commute and
        # the shift is constant within each pooled pair, so this is exact.
        hb = h.astype(bf16)
        ye = jnp.dot(hb, me_ref[...], preferred_element_type=f32)
        yo = jnp.dot(hb, mo_ref[...], preferred_element_type=f32)
        return jnp.maximum(jnp.maximum(ye, yo) + s_ref[...], 0.0)

    def conv_relu(h, m_ref, s_ref):
        y = jnp.dot(h.astype(bf16), m_ref[...], preferred_element_type=f32) + s_ref[...]
        return jnp.maximum(y, 0.0)

    h = conv_pool_relu(x_ref[...], m0e_ref, m0o_ref, s0_ref)   # (B, 4*L/8)
    h = conv_pool_relu(h, m1e_ref, m1o_ref, s1_ref)            # (B, 8*L/32)
    h = conv_pool_relu(h, m2e_ref, m2o_ref, s2_ref)            # (B, 16*L/128)
    h = conv_relu(h, m3_ref, s3_ref)                           # (B, D*T) channel-major

    # cnn_dropout: identity in eval mode.

    # Hoisted LSTM layer-1 input projection (+ both biases) for all timesteps;
    # wxa also performs the channel-major -> time-major relayout.  Stored into a
    # (T, B, 4H) VMEM scratch so the recurrence can index timesteps dynamically.
    xproj = jnp.dot(h.astype(bf16), wxa_ref[...], preferred_element_type=f32) + b1a_ref[...]
    for t in range(T):
        xp_ref[t] = xproj[:, t * 4 * H:(t + 1) * 4 * H]

    # Broadcast compressed lengths once (hoisted out of the time loop).
    lens = jnp.broadcast_to(lens_ref[...], (B, H))              # (B, H) f32

    zero = jnp.zeros((B, H), f32)
    h1_ref[...] = zero
    c1_ref[...] = zero
    h2_ref[...] = zero
    c2_ref[...] = zero

    def cell(g, c_prev):
        # PyTorch gate order i, f, g, o.  One full-width sigmoid EUP push + one
        # tanh on the 64-lane g slice (instead of 4 partial-width pushes).
        s = jax.nn.sigmoid(g)                                   # (B, 4H)
        gg = jnp.tanh(g[:, 2 * H:3 * H])
        c_new = s[:, H:2 * H] * c_prev + s[:, 0:H] * gg
        return s[:, 3 * H:4 * H] * jnp.tanh(c_new), c_new

    # Per-tile trip count (scalar-prefetched): skip fully-masked tail timesteps.
    nsteps = jnp.minimum(maxt_ref[pl.program_id(0)], T)

    @pl.loop(0, nsteps)
    def _(t):
        mask = lens > jnp.asarray(t, dtype=f32)   # pack_padded_sequence semantics
        h1 = h1_ref[...]
        h2 = h2_ref[...]
        # Both recurrent matmuls fused into one K=2H contraction:
        # grec = [h1, h2] @ blockdiag(Whh1^T, Whh2^T)  -> (B, 8H)
        grec = jnp.dot(jnp.concatenate([h1, h2], axis=1), wrec_ref[...],
                       preferred_element_type=f32)
        h1n, c1n = cell(xp_ref[t] + grec[:, :4 * H], c1_ref[...])
        h1n = jnp.where(mask, h1n, h1)
        c1n = jnp.where(mask, c1n, c1_ref[...])
        h1_ref[...] = h1n
        c1_ref[...] = c1n
        # inter-layer dropout: identity in eval mode
        g2 = (jnp.dot(h1n, wih2_ref[...], preferred_element_type=f32)
              + grec[:, 4 * H:] + b2_ref[...])
        h2n, c2n = cell(g2, c2_ref[...])
        h2_ref[...] = jnp.where(mask, h2n, h2)
        c2_ref[...] = jnp.where(mask, c2n, c2_ref[...])

    # h2 == h_n[-1]; final_dropout identity in eval mode.
    # regressor Linear(H -> 1) as a lane reduction, then sigmoid.
    logits = jnp.sum(h2_ref[...] * wr_ref[...], axis=-1, keepdims=True) + br_ref[...]
    out_ref[...] = jax.nn.sigmoid(logits)


# ---------------------------------------------------------------------------
# Parameter pre-packing (done once, outside the forward pass)
# ---------------------------------------------------------------------------
def _conv_as_matmul(w, scale, L_in, stride, pad, in_layout):
    """Banded matrix M so that flat_out = flat_in @ M implements Conv1d (+BN scale).

    flat_in layout:  'lc' -> index l*C_in + cin   (raw (B, L, C) input, reshaped)
                     'cl' -> index cin*L_in + l   (channel-major intermediates)
    flat_out layout: co*L_out + l (channel-major).  Zero padding is implicit.
    """
    C_out, C_in, K = w.shape
    L_out = (L_in + 2 * pad - K) // stride + 1
    rows, cols, cos, cis, ks = [], [], [], [], []
    for co in range(C_out):
        for l in range(L_out):
            for ci in range(C_in):
                for k in range(K):
                    j = stride * l + k - pad
                    if 0 <= j < L_in:
                        rows.append(j * C_in + ci if in_layout == "lc" else ci * L_in + j)
                        cols.append(co * L_out + l)
                        cos.append(co)
                        cis.append(ci)
                        ks.append(k)
    cos = jnp.asarray(cos, jnp.int32)
    vals = w[cos, jnp.asarray(cis, jnp.int32), jnp.asarray(ks, jnp.int32)] * scale[cos]
    M = jnp.zeros((C_in * L_in, C_out * L_out), jnp.float32)
    M = M.at[jnp.asarray(rows, jnp.int32), jnp.asarray(cols, jnp.int32)].set(vals)
    return M, L_out


def _fold_pool(M, C, L_conv):
    """Fold MaxPool1d(2,2) into the conv matrix by even/odd column selection."""
    L_out = (L_conv - 2) // 2 + 1
    cols_e = np.asarray([c * L_conv + 2 * i for c in range(C) for i in range(L_out)],
                        np.int32)
    Me = jnp.take(M, jnp.asarray(cols_e), axis=1)
    Mo = jnp.take(M, jnp.asarray(cols_e + 1), axis=1)
    return Me, Mo, L_out


def pack_params(params, L):
    """Fold BN + conv bias + MaxPool, build conv/LSTM matmul matrices (bulk in bf16)."""
    tensors = []
    L_cur = L
    layout = "lc"
    for lp in params["cnn"]:
        scale = lp["gamma"] / jnp.sqrt(lp["rvar"] + 1e-5)
        shift = scale * (lp["b"] - lp["rmean"]) + lp["beta"]
        M, L_conv = _conv_as_matmul(lp["w"], scale, L_cur, lp["stride"], lp["pad"], layout)
        C_out = lp["w"].shape[0]
        if lp["pool"]:
            Me, Mo, L_cur = _fold_pool(M, C_out, L_conv)
            tensors += [Me.astype(jnp.bfloat16), Mo.astype(jnp.bfloat16)]
        else:
            L_cur = L_conv
            tensors += [M.astype(jnp.bfloat16)]
        shift_flat = jnp.repeat(shift, L_cur).reshape(1, C_out * L_cur).astype(jnp.float32)
        tensors += [shift_flat]
        layout = "cl"

    T = L_cur  # compressed number of timesteps after the CNN
    H = LSTM_HIDDEN
    lstm = params["lstm"]
    D = lstm["w_ih1"].shape[1]

    # Layer-1 input projection hoisted over all timesteps; wxa[d*T+t, t*4H+g] = Wih1^T[d,g]
    wx1 = lstm["w_ih1"].T.astype(jnp.float32)                      # (D, 4H)
    eyeT = jnp.eye(T, dtype=jnp.float32)
    wxa = jnp.einsum("dg,tu->dtug", wx1, eyeT).reshape(D * T, T * 4 * H)
    b1 = (lstm["b_ih1"] + lstm["b_hh1"]).reshape(1, 4 * H).astype(jnp.float32)
    b1a = jnp.tile(b1, (1, T))                                     # (1, T*4H)

    # Fused recurrent weight: blockdiag(Whh1^T, Whh2^T), kept f32 (tiny, serial path).
    whh1t = lstm["w_hh1"].T.astype(jnp.float32)                    # (H, 4H)
    whh2t = lstm["w_hh2"].T.astype(jnp.float32)                    # (H, 4H)
    wrec = jnp.zeros((2 * H, 8 * H), jnp.float32)
    wrec = wrec.at[:H, :4 * H].set(whh1t)
    wrec = wrec.at[H:, 4 * H:].set(whh2t)

    wih2 = lstm["w_ih2"].T.astype(jnp.float32)                     # (H, 4H)
    b2 = (lstm["b_ih2"] + lstm["b_hh2"]).reshape(1, 4 * H).astype(jnp.float32)
    wr = lstm["w_reg"].reshape(1, H).astype(jnp.float32)
    br = lstm["b_reg"].reshape(1, 1).astype(jnp.float32)

    tensors += [wxa.astype(jnp.bfloat16), b1a, wrec, wih2, b2, wr, br]
    return {"tensors": tensors, "T": T}


# ---------------------------------------------------------------------------
# Full forward pass: a single pallas_call, gridded over batch tiles
# ---------------------------------------------------------------------------
def unified_battery_model(x, lengths, packed):
    # x: (B, L, input_size) f32; lengths: (B,) int32, sorted descending
    B, L, C_in = x.shape
    T = packed["T"]
    H = LSTM_HIDDEN
    tensors = packed["tensors"]

    # Pad the batch to a full sublane tile; padded rows are discarded at the end.
    Bp = ((B + BATCH_TILE - 1) // BATCH_TILE) * BATCH_TILE
    num_tiles = Bp // BATCH_TILE

    x_flat = x.reshape(B, L * C_in)  # row-major reshape: free, no data movement
    comp = jnp.maximum(lengths // COMPRESS_FACTOR, 1).astype(jnp.int32)
    if Bp != B:
        x_flat = jnp.pad(x_flat, ((0, Bp - B), (0, 0)))
        comp = jnp.pad(comp, (0, Bp - B), constant_values=1)
    comp_f = comp.astype(jnp.float32).reshape(Bp, 1)
    # Per-tile upper bound on LSTM steps (lengths sorted descending -> tight bound).
    maxt = jnp.minimum(jnp.max(comp.reshape(num_tiles, BATCH_TILE), axis=1),
                       T).astype(jnp.int32)

    # Weights: full-array blocks with a constant index_map -> DMA'd once, VMEM-resident.
    weight_specs = [pl.BlockSpec(t.shape, lambda i, *_: (0, 0)) for t in tensors]
    grid_spec = pltpu.PrefetchScalarGridSpec(
        num_scalar_prefetch=1,          # maxt -> SMEM
        grid=(num_tiles,),
        in_specs=[pl.BlockSpec((BATCH_TILE, L * C_in), lambda i, *_: (i, 0)),
                  pl.BlockSpec((BATCH_TILE, 1), lambda i, *_: (i, 0))] + weight_specs,
        # TODO(synk): for very large batches, emit a lane-dense output (B on lanes)
        # instead of (B, 1) to avoid masked vst stores.
        out_specs=pl.BlockSpec((BATCH_TILE, 1), lambda i, *_: (i, 0)),
        scratch_shapes=[pltpu.VMEM((T, BATCH_TILE, 4 * H), jnp.float32)]
                     + [pltpu.VMEM((BATCH_TILE, H), jnp.float32)] * 4,
    )

    # Explicit scoped-VMEM budget (v5e default is only 16 MiB).
    weight_bytes = sum(int(t.size) * t.dtype.itemsize for t in tensors)
    x_tile_bytes = BATCH_TILE * L * C_in * 4
    scratch_bytes = (T * BATCH_TILE * 4 * H + 4 * BATCH_TILE * H) * 4
    vmem_limit = min(64 * 1024 * 1024,
                     2 * (weight_bytes + x_tile_bytes) + scratch_bytes + (16 << 20))

    kernel = functools.partial(_fused_kernel, T=T, H=H)
    out = pl.pallas_call(
        kernel,
        out_shape=jax.ShapeDtypeStruct((Bp, 1), jnp.float32),
        grid_spec=grid_spec,
        compiler_params=pltpu.CompilerParams(
            dimension_semantics=("parallel",),   # batch tiles shard across TCs on v7x
            vmem_limit_bytes=int(vmem_limit)),
    )(maxt, x_flat, comp_f, *tensors)
    return out[:B]


# ---------------------------------------------------------------------------
# Deterministic parameter initialization (shapes match the PyTorch __init__)
# ---------------------------------------------------------------------------
def init_params(key):
    keys = jax.random.split(key, 5)
    cnn = []
    kconv = jax.random.split(keys[0], 2 * len(CONV_CFG))
    for idx, (cin, cout, k, s, p, pool) in enumerate(CONV_CFG):
        bound = 1.0 / float(np.sqrt(cin * k))
        w = jax.random.uniform(kconv[2 * idx], (cout, cin, k), jnp.float32, -bound, bound)
        b = jax.random.uniform(kconv[2 * idx + 1], (cout,), jnp.float32, -bound, bound)
        cnn.append(dict(
            w=w, b=b,
            gamma=jnp.ones((cout,), jnp.float32),
            beta=jnp.zeros((cout,), jnp.float32),
            rmean=jnp.zeros((cout,), jnp.float32),
            rvar=jnp.ones((cout,), jnp.float32),
            stride=s, pad=p, pool=pool,
        ))

    H = LSTM_HIDDEN
    bound = 1.0 / float(np.sqrt(H))
    k1 = jax.random.split(keys[1], 4)
    k2 = jax.random.split(keys[2], 4)
    lstm = dict(
        w_ih1=jax.random.uniform(k1[0], (4 * H, CNN_HIDDEN), jnp.float32, -bound, bound),
        w_hh1=jax.random.uniform(k1[1], (4 * H, H), jnp.float32, -bound, bound),
        b_ih1=jax.random.uniform(k1[2], (4 * H,), jnp.float32, -bound, bound),
        b_hh1=jax.random.uniform(k1[3], (4 * H,), jnp.float32, -bound, bound),
        w_ih2=jax.random.uniform(k2[0], (4 * H, H), jnp.float32, -bound, bound),
        w_hh2=jax.random.uniform(k2[1], (4 * H, H), jnp.float32, -bound, bound),
        b_ih2=jax.random.uniform(k2[2], (4 * H,), jnp.float32, -bound, bound),
        b_hh2=jax.random.uniform(k2[3], (4 * H,), jnp.float32, -bound, bound),
        w_reg=jax.random.uniform(keys[3], (1, H), jnp.float32, -bound, bound),
        b_reg=jax.random.uniform(keys[4], (1,), jnp.float32, -bound, bound),
    )
    return dict(cnn=cnn, lstm=lstm)


if __name__ == "__main__":
    key = jax.random.PRNGKey(0)
    kx, kp = jax.random.split(key)

    B, L = 16, 256  # two batch tiles -> exercises the grid + weight residency
    x = jax.random.normal(kx, (B, L, INPUT_SIZE), dtype=jnp.float32)
    lengths = jnp.array([256, 250, 240, 230, 224, 210, 200, 192,
                         180, 170, 160, 150, 144, 140, 130, 128], dtype=jnp.int32)

    params = init_params(kp)
    packed = pack_params(params, L)  # one-time packing (per sequence length)

    out = unified_battery_model(x, lengths, packed)
    out = jax.block_until_ready(out)
    assert out.shape == (B, 1)
    assert bool(jnp.all(jnp.isfinite(out)))
    print("KERNEL_OK")
</pallas_src>

<mosaic_0001>
module attributes {stable_mosaic.version = 11 : i64} {
  func.func @_fused_kernel(%arg0: i32, %arg1: memref<2xi32, #tpu.memory_space<smem>>, %arg2: memref<8x512xf32, #tpu.memory_space<vmem>>, %arg3: memref<8x1xf32, #tpu.memory_space<vmem>>, %arg4: memref<512x256xbf16, #tpu.memory_space<vmem>>, %arg5: memref<512x256xbf16, #tpu.memory_space<vmem>>, %arg6: memref<1x256xf32, #tpu.memory_space<vmem>>, %arg7: memref<256x128xbf16, #tpu.memory_space<vmem>>, %arg8: memref<256x128xbf16, #tpu.memory_space<vmem>>, %arg9: memref<1x128xf32, #tpu.memory_space<vmem>>, %arg10: memref<128x64xbf16, #tpu.memory_space<vmem>>, %arg11: memref<128x64xbf16, #tpu.memory_space<vmem>>, %arg12: memref<1x64xf32, #tpu.memory_space<vmem>>, %arg13: memref<64x32xbf16, #tpu.memory_space<vmem>>, %arg14: memref<1x32xf32, #tpu.memory_space<vmem>>, %arg15: memref<32x512xbf16, #tpu.memory_space<vmem>>, %arg16: memref<1x512xf32, #tpu.memory_space<vmem>>, %arg17: memref<128x512xf32, #tpu.memory_space<vmem>>, %arg18: memref<64x256xf32, #tpu.memory_space<vmem>>, %arg19: memref<1x256xf32, #tpu.memory_space<vmem>>, %arg20: memref<1x64xf32, #tpu.memory_space<vmem>>, %arg21: memref<1x1xf32, #tpu.memory_space<vmem>>, %arg22: memref<8x1xf32, #tpu.memory_space<vmem>>, %arg23: memref<2x8x256xf32, #tpu.memory_space<vmem>>, %arg24: memref<8x64xf32, #tpu.memory_space<vmem>>, %arg25: memref<8x64xf32, #tpu.memory_space<vmem>>, %arg26: memref<8x64xf32, #tpu.memory_space<vmem>>, %arg27: memref<8x64xf32, #tpu.memory_space<vmem>>) attributes {dimension_semantics = [#tpu.dimension_semantics<parallel>], iteration_bounds = array<i64: 2>, scalar_prefetch = 1 : i64, scratch_operands = 5 : i64, tpu.core_type = #tpu.core_type<tc>, window_params = [{transform_indices = @transform_0, window_bounds = array<i64: 8, 512>}, {transform_indices = @transform_1, window_bounds = array<i64: 8, 1>}, {pipeline_mode = #tpu.pipeline_mode<synchronous>, transform_indices = @transform_2, window_bounds = array<i64: 512, 256>}, {pipeline_mode = #tpu.pipeline_mode<synchronous>, transform_indices = @transform_3, window_bounds = array<i64: 512, 256>}, {pipeline_mode = #tpu.pipeline_mode<synchronous>, transform_indices = @transform_4, window_bounds = array<i64: 1, 256>}, {pipeline_mode = #tpu.pipeline_mode<synchronous>, transform_indices = @transform_5, window_bounds = array<i64: 256, 128>}, {pipeline_mode = #tpu.pipeline_mode<synchronous>, transform_indices = @transform_6, window_bounds = array<i64: 256, 128>}, {pipeline_mode = #tpu.pipeline_mode<synchronous>, transform_indices = @transform_7, window_bounds = array<i64: 1, 128>}, {pipeline_mode = #tpu.pipeline_mode<synchronous>, transform_indices = @transform_8, window_bounds = array<i64: 128, 64>}, {pipeline_mode = #tpu.pipeline_mode<synchronous>, transform_indices = @transform_9, window_bounds = array<i64: 128, 64>}, {pipeline_mode = #tpu.pipeline_mode<synchronous>, transform_indices = @transform_10, window_bounds = array<i64: 1, 64>}, {pipeline_mode = #tpu.pipeline_mode<synchronous>, transform_indices = @transform_11, window_bounds = array<i64: 64, 32>}, {pipeline_mode = #tpu.pipeline_mode<synchronous>, transform_indices = @transform_12, window_bounds = array<i64: 1, 32>}, {pipeline_mode = #tpu.pipeline_mode<synchronous>, transform_indices = @transform_13, window_bounds = array<i64: 32, 512>}, {pipeline_mode = #tpu.pipeline_mode<synchronous>, transform_indices = @transform_14, window_bounds = array<i64: 1, 512>}, {pipeline_mode = #tpu.pipeline_mode<synchronous>, transform_indices = @transform_15, window_bounds = array<i64: 128, 512>}, {pipeline_mode = #tpu.pipeline_mode<synchronous>, transform_indices = @transform_16, window_bounds = array<i64: 64, 256>}, {pipeline_mode = #tpu.pipeline_mode<synchronous>, transform_indices = @transform_17, window_bounds = array<i64: 1, 256>}, {pipeline_mode = #tpu.pipeline_mode<synchronous>, transform_indices = @transform_18, window_bounds = array<i64: 1, 64>}, {pipeline_mode = #tpu.pipeline_mode<synchronous>, transform_indices = @transform_19, window_bounds = array<i64: 1, 1>}, {transform_indices = @transform_20, window_bounds = array<i64: 8, 1>}]} {
    %c0 = arith.constant 0 : index
    %c0_0 = arith.constant 0 : index
    %0 = vector.load %arg2[%c0, %c0_0] : memref<8x512xf32, #tpu.memory_space<vmem>>, vector<8x512xf32>
    %1 = arith.truncf %0 : vector<8x512xf32> to vector<8x512xbf16>
    %c0_1 = arith.constant 0 : index
    %c0_2 = arith.constant 0 : index
    %2 = vector.load %arg4[%c0_1, %c0_2] : memref<512x256xbf16, #tpu.memory_space<vmem>>, vector<512x256xbf16>
    %cst = arith.constant dense<0.000000e+00> : vector<8x256xf32>
    %3 = tpu.matmul %1, %2, %cst {dimension_numbers = #tpu.dot_dimension_numbers<[1], [0], [0], [1], [0, 0, 1, 1], [], []>} : vector<8x512xbf16>, vector<512x256xbf16>, vector<8x256xf32> -> vector<8x256xf32>
    %c0_3 = arith.constant 0 : index
    %c0_4 = arith.constant 0 : index
    %4 = vector.load %arg5[%c0_3, %c0_4] : memref<512x256xbf16, #tpu.memory_space<vmem>>, vector<512x256xbf16>
    %cst_5 = arith.constant dense<0.000000e+00> : vector<8x256xf32>
    %5 = tpu.matmul %1, %4, %cst_5 {dimension_numbers = #tpu.dot_dimension_numbers<[1], [0], [0], [1], [0, 0, 1, 1], [], []>} : vector<8x512xbf16>, vector<512x256xbf16>, vector<8x256xf32> -> vector<8x256xf32>
    %6 = arith.maximumf %3, %5 : vector<8x256xf32>
    %c0_6 = arith.constant 0 : index
    %c0_7 = arith.constant 0 : index
    %7 = vector.load %arg6[%c0_6, %c0_7] : memref<1x256xf32, #tpu.memory_space<vmem>>, vector<1x256xf32>
    %8 = vector.broadcast %7 : vector<1x256xf32> to vector<8x256xf32>
    %9 = arith.addf %6, %8 : vector<8x256xf32>
    %cst_8 = arith.constant 0.000000e+00 : f32
    %10 = vector.broadcast %cst_8 : f32 to vector<8x256xf32>
    %11 = arith.maximumf %9, %10 : vector<8x256xf32>
    %12 = arith.truncf %11 : vector<8x256xf32> to vector<8x256xbf16>
    %c0_9 = arith.constant 0 : index
    %c0_10 = arith.constant 0 : index
    %13 = vector.load %arg7[%c0_9, %c0_10] : memref<256x128xbf16, #tpu.memory_space<vmem>>, vector<256x128xbf16>
    %cst_11 = arith.constant dense<0.000000e+00> : vector<8x128xf32>
    %14 = tpu.matmul %12, %13, %cst_11 {dimension_numbers = #tpu.dot_dimension_numbers<[1], [0], [0], [1], [0, 0, 1, 1], [], []>} : vector<8x256xbf16>, vector<256x128xbf16>, vector<8x128xf32> -> vector<8x128xf32>
    %c0_12 = arith.constant 0 : index
    %c0_13 = arith.constant 0 : index
    %15 = vector.load %arg8[%c0_12, %c0_13] : memref<256x128xbf16, #tpu.memory_space<vmem>>, vector<256x128xbf16>
    %cst_14 = arith.constant dense<0.000000e+00> : vector<8x128xf32>
    %16 = tpu.matmul %12, %15, %cst_14 {dimension_numbers = #tpu.dot_dimension_numbers<[1], [0], [0], [1], [0, 0, 1, 1], [], []>} : vector<8x256xbf16>, vector<256x128xbf16>, vector<8x128xf32> -> vector<8x128xf32>
    %17 = arith.maximumf %14, %16 : vector<8x128xf32>
    %c0_15 = arith.constant 0 : index
    %c0_16 = arith.constant 0 : index
    %18 = vector.load %arg9[%c0_15, %c0_16] : memref<1x128xf32, #tpu.memory_space<vmem>>, vector<1x128xf32>
    %19 = vector.broadcast %18 : vector<1x128xf32> to vector<8x128xf32>
    %20 = arith.addf %17, %19 : vector<8x128xf32>
    %cst_17 = arith.constant 0.000000e+00 : f32
    %21 = vector.broadcast %cst_17 : f32 to vector<8x128xf32>
    %22 = arith.maximumf %20, %21 : vector<8x128xf32>
    %23 = arith.truncf %22 : vector<8x128xf32> to vector<8x128xbf16>
    %c0_18 = arith.constant 0 : index
    %c0_19 = arith.constant 0 : index
    %24 = vector.load %arg10[%c0_18, %c0_19] : memref<128x64xbf16, #tpu.memory_space<vmem>>, vector<128x64xbf16>
    %cst_20 = arith.constant dense<0.000000e+00> : vector<8x64xf32>
    %25 = tpu.matmul %23, %24, %cst_20 {dimension_numbers = #tpu.dot_dimension_numbers<[1], [0], [0], [1], [0, 0, 1, 1], [], []>} : vector<8x128xbf16>, vector<128x64xbf16>, vector<8x64xf32> -> vector<8x64xf32>
    %c0_21 = arith.constant 0 : index
    %c0_22 = arith.constant 0 : index
    %26 = vector.load %arg11[%c0_21, %c0_22] : memref<128x64xbf16, #tpu.memory_space<vmem>>, vector<128x64xbf16>
    %cst_23 = arith.constant dense<0.000000e+00> : vector<8x64xf32>
    %27 = tpu.matmul %23, %26, %cst_23 {dimension_numbers = #tpu.dot_dimension_numbers<[1], [0], [0], [1], [0, 0, 1, 1], [], []>} : vector<8x128xbf16>, vector<128x64xbf16>, vector<8x64xf32> -> vector<8x64xf32>
    %28 = arith.maximumf %25, %27 : vector<8x64xf32>
    %c0_24 = arith.constant 0 : index
    %c0_25 = arith.constant 0 : index
    %29 = vector.load %arg12[%c0_24, %c0_25] : memref<1x64xf32, #tpu.memory_space<vmem>>, vector<1x64xf32>
    %30 = vector.broadcast %29 : vector<1x64xf32> to vector<8x64xf32>
    %31 = arith.addf %28, %30 : vector<8x64xf32>
    %cst_26 = arith.constant 0.000000e+00 : f32
    %32 = vector.broadcast %cst_26 : f32 to vector<8x64xf32>
    %33 = arith.maximumf %31, %32 : vector<8x64xf32>
    %34 = arith.truncf %33 : vector<8x64xf32> to vector<8x64xbf16>
    %c0_27 = arith.constant 0 : index
    %c0_28 = arith.constant 0 : index
    %35 = vector.load %arg13[%c0_27, %c0_28] : memref<64x32xbf16, #tpu.memory_space<vmem>>, vector<64x32xbf16>
    %cst_29 = arith.constant dense<0.000000e+00> : vector<8x32xf32>
    %36 = tpu.matmul %34, %35, %cst_29 {dimension_numbers = #tpu.dot_dimension_numbers<[1], [0], [0], [1], [0, 0, 1, 1], [], []>} : vector<8x64xbf16>, vector<64x32xbf16>, vector<8x32xf32> -> vector<8x32xf32>
    %c0_30 = arith.constant 0 : index
    %c0_31 = arith.constant 0 : index
    %37 = vector.load %arg14[%c0_30, %c0_31] : memref<1x32xf32, #tpu.memory_space<vmem>>, vector<1x32xf32>
    %38 = vector.broadcast %37 : vector<1x32xf32> to vector<8x32xf32>
    %39 = arith.addf %36, %38 : vector<8x32xf32>
    %cst_32 = arith.constant 0.000000e+00 : f32
    %40 = vector.broadcast %cst_32 : f32 to vector<8x32xf32>
    %41 = arith.maximumf %39, %40 : vector<8x32xf32>
    %42 = arith.truncf %41 : vector<8x32xf32> to vector<8x32xbf16>
    %c0_33 = arith.constant 0 : index
    %c0_34 = arith.constant 0 : index
    %43 = vector.load %arg15[%c0_33, %c0_34] : memref<32x512xbf16, #tpu.memory_space<vmem>>, vector<32x512xbf16>
    %cst_35 = arith.constant dense<0.000000e+00> : vector<8x512xf32>
    %44 = tpu.matmul %42, %43, %cst_35 {dimension_numbers = #tpu.dot_dimension_numbers<[1], [0], [0], [1], [0, 0, 1, 1], [], []>} : vector<8x32xbf16>, vector<32x512xbf16>, vector<8x512xf32> -> vector<8x512xf32>
    %c0_36 = arith.constant 0 : index
    %c0_37 = arith.constant 0 : index
    %45 = vector.load %arg16[%c0_36, %c0_37] : memref<1x512xf32, #tpu.memory_space<vmem>>, vector<1x512xf32>
    %46 = vector.broadcast %45 : vector<1x512xf32> to vector<8x512xf32>
    %47 = arith.addf %44, %46 : vector<8x512xf32>
    %48 = vector.extract_strided_slice %47 {offsets = [0, 0], sizes = [8, 256], strides = [1, 1]} : vector<8x512xf32> to vector<8x256xf32>
    %c0_38 = arith.constant 0 : index
    %c0_39 = arith.constant 0 : index
    %c0_40 = arith.constant 0 : index
    %49 = vector.load %arg23[%c0_38, %c0_39, %c0_40] : memref<2x8x256xf32, #tpu.memory_space<vmem>>, vector<1x8x256xf32>
    %50 = vector.shape_cast %49 : vector<1x8x256xf32> to vector<8x256xf32>
    %51 = vector.shape_cast %48 : vector<8x256xf32> to vector<1x8x256xf32>
    tpu.vector_store %arg23[%c0_38, %c0_39, %c0_40], %51 {strides = array<i32>} : memref<2x8x256xf32, #tpu.memory_space<vmem>>, vector<1x8x256xf32>,
    %52 = vector.extract_strided_slice %47 {offsets = [0, 256], sizes = [8, 256], strides = [1, 1]} : vector<8x512xf32> to vector<8x256xf32>
    %c1 = arith.constant 1 : index
    %c0_41 = arith.constant 0 : index
    %c0_42 = arith.constant 0 : index
    %53 = vector.load %arg23[%c1, %c0_41, %c0_42] : memref<2x8x256xf32, #tpu.memory_space<vmem>>, vector<1x8x256xf32>
    %54 = vector.shape_cast %53 : vector<1x8x256xf32> to vector<8x256xf32>
    %55 = vector.shape_cast %52 : vector<8x256xf32> to vector<1x8x256xf32>
    tpu.vector_store %arg23[%c1, %c0_41, %c0_42], %55 {strides = array<i32>} : memref<2x8x256xf32, #tpu.memory_space<vmem>>, vector<1x8x256xf32>,
    %c0_43 = arith.constant 0 : index
    %c0_44 = arith.constant 0 : index
    %56 = vector.load %arg3[%c0_43, %c0_44] : memref<8x1xf32, #tpu.memory_space<vmem>>, vector<8x1xf32>
    %57 = vector.shape_cast %56 : vector<8x1xf32> to vector<8x1xf32>
    %58 = vector.broadcast %57 : vector<8x1xf32> to vector<8x64xf32>
    %cst_45 = arith.constant 0.000000e+00 : f32
    %59 = vector.broadcast %cst_45 : f32 to vector<8x64xf32>
    %c0_46 = arith.constant 0 : index
    %c0_47 = arith.constant 0 : index
    %60 = vector.load %arg24[%c0_46, %c0_47] : memref<8x64xf32, #tpu.memory_space<vmem>>, vector<8x64xf32>
    tpu.vector_store %arg24[%c0_46, %c0_47], %59 {strides = array<i32>} : memref<8x64xf32, #tpu.memory_space<vmem>>, vector<8x64xf32>,
    %c0_48 = arith.constant 0 : index
    %c0_49 = arith.constant 0 : index
    %61 = vector.load %arg25[%c0_48, %c0_49] : memref<8x64xf32, #tpu.memory_space<vmem>>, vector<8x64xf32>
    tpu.vector_store %arg25[%c0_48, %c0_49], %59 {strides = array<i32>} : memref<8x64xf32, #tpu.memory_space<vmem>>, vector<8x64xf32>,
    %c0_50 = arith.constant 0 : index
    %c0_51 = arith.constant 0 : index
    %62 = vector.load %arg26[%c0_50, %c0_51] : memref<8x64xf32, #tpu.memory_space<vmem>>, vector<8x64xf32>
    tpu.vector_store %arg26[%c0_50, %c0_51], %59 {strides = array<i32>} : memref<8x64xf32, #tpu.memory_space<vmem>>, vector<8x64xf32>,
    %c0_52 = arith.constant 0 : index
    %c0_53 = arith.constant 0 : index
    %63 = vector.load %arg27[%c0_52, %c0_53] : memref<8x64xf32, #tpu.memory_space<vmem>>, vector<8x64xf32>
    tpu.vector_store %arg27[%c0_52, %c0_53], %59 {strides = array<i32>} : memref<8x64xf32, #tpu.memory_space<vmem>>, vector<8x64xf32>,
    %64 = arith.index_cast %arg0 : i32 to index
    %65 = memref.load %arg1[%64] : memref<2xi32, #tpu.memory_space<smem>>
    %c2_i32 = arith.constant 2 : i32
    %66 = arith.minsi %65, %c2_i32 : i32
    %c0_i32 = arith.constant 0 : i32
    %67 = arith.subi %66, %c0_i32 : i32
    %c1_i32 = arith.constant 1 : i32
    %c1_i32_54 = arith.constant 1 : i32
    %68 = arith.subi %c1_i32, %c1_i32_54 : i32
    %69 = arith.addi %67, %68 : i32
    %c1_i32_55 = arith.constant 1 : i32
    %70 = arith.divsi %69, %c1_i32_55 : i32
    %c1_i32_56 = arith.constant 1 : i32
    %c0_i32_57 = arith.constant 0 : i32
    %c0_i32_58 = arith.constant 0 : i32
    %71 = arith.subi %70, %c0_i32_58 : i32
    %72 = arith.addi %c0_i32_58, %71 : i32
    %c1_i32_59 = arith.constant 1 : i32
    scf.for %arg28 = %c0_i32_58 to %72 step %c1_i32_59  : i32 {
      %88 = arith.muli %arg28, %c1_i32_56 : i32
      %89 = arith.addi %c0_i32_57, %88 : i32
      %90 = arith.sitofp %89 : i32 to f32
      %91 = vector.broadcast %90 : f32 to vector<8x64xf32>
      %92 = arith.cmpf ogt, %58, %91 : vector<8x64xf32>
      %c0_70 = arith.constant 0 : index
      %c0_71 = arith.constant 0 : index
      %93 = vector.load %arg24[%c0_70, %c0_71] : memref<8x64xf32, #tpu.memory_space<vmem>>, vector<8x64xf32>
      %c0_72 = arith.constant 0 : index
      %c0_73 = arith.constant 0 : index
      %94 = vector.load %arg26[%c0_72, %c0_73] : memref<8x64xf32, #tpu.memory_space<vmem>>, vector<8x64xf32>
      %95 = tpu.concatenate %93, %94 in 1 : vector<8x64xf32>, vector<8x64xf32> -> vector<8x128xf32>
      %c0_74 = arith.constant 0 : index
      %c0_75 = arith.constant 0 : index
      %96 = vector.load %arg17[%c0_74, %c0_75] : memref<128x512xf32, #tpu.memory_space<vmem>>, vector<128x512xf32>
      %cst_76 = arith.constant dense<0.000000e+00> : vector<8x512xf32>
      %97 = tpu.matmul %95, %96, %cst_76 {dimension_numbers = #tpu.dot_dimension_numbers<[1], [0], [0], [1], [0, 0, 1, 1], [], []>} : vector<8x128xf32>, vector<128x512xf32>, vector<8x512xf32> -> vector<8x512xf32>
      %98 = arith.index_cast %89 : i32 to index
      %c0_77 = arith.constant 0 : index
      %c0_78 = arith.constant 0 : index
      %99 = vector.load %arg23[%98, %c0_77, %c0_78] : memref<2x8x256xf32, #tpu.memory_space<vmem>>, vector<1x8x256xf32>
      %100 = vector.shape_cast %99 : vector<1x8x256xf32> to vector<8x256xf32>
      %101 = vector.extract_strided_slice %97 {offsets = [0, 0], sizes = [8, 256], strides = [1, 1]} : vector<8x512xf32> to vector<8x256xf32>
      %102 = arith.addf %100, %101 : vector<8x256xf32>
      %c0_79 = arith.constant 0 : index
      %c0_80 = arith.constant 0 : index
      %103 = vector.load %arg25[%c0_79, %c0_80] : memref<8x64xf32, #tpu.memory_space<vmem>>, vector<8x64xf32>
      %104 = arith.negf %102 : vector<8x256xf32>
      %105 = math.exp %104 : vector<8x256xf32>
      %cst_81 = arith.constant 1.000000e+00 : f32
      %106 = vector.broadcast %cst_81 : f32 to vector<8x256xf32>
      %107 = arith.addf %106, %105 : vector<8x256xf32>
      %108 = arith.divf %106, %107 : vector<8x256xf32>
      %109 = vector.extract_strided_slice %102 {offsets = [0, 128], sizes = [8, 64], strides = [1, 1]} : vector<8x256xf32> to vector<8x64xf32>
      %110 = math.tanh %109 : vector<8x64xf32>
      %111 = vector.extract_strided_slice %108 {offsets = [0, 64], sizes = [8, 64], strides = [1, 1]} : vector<8x256xf32> to vector<8x64xf32>
      %112 = arith.mulf %111, %103 : vector<8x64xf32>
      %113 = vector.extract_strided_slice %108 {offsets = [0, 0], sizes = [8, 64], strides = [1, 1]} : vector<8x256xf32> to vector<8x64xf32>
      %114 = arith.mulf %113, %110 : vector<8x64xf32>
      %115 = arith.addf %112, %114 : vector<8x64xf32>
      %116 = vector.extract_strided_slice %108 {offsets = [0, 192], sizes = [8, 64], strides = [1, 1]} : vector<8x256xf32> to vector<8x64xf32>
      %117 = math.tanh %115 : vector<8x64xf32>
      %118 = arith.mulf %116, %117 : vector<8x64xf32>
      %119 = arith.select %92, %118, %93 : vector<8x64xi1>, vector<8x64xf32>
      %c0_82 = arith.constant 0 : index
      %c0_83 = arith.constant 0 : index
      %120 = vector.load %arg25[%c0_82, %c0_83] : memref<8x64xf32, #tpu.memory_space<vmem>>, vector<8x64xf32>
      %121 = arith.select %92, %115, %120 : vector<8x64xi1>, vector<8x64xf32>
      %c0_84 = arith.constant 0 : index
      %c0_85 = arith.constant 0 : index
      %122 = vector.load %arg24[%c0_84, %c0_85] : memref<8x64xf32, #tpu.memory_space<vmem>>, vector<8x64xf32>
      tpu.vector_store %arg24[%c0_84, %c0_85], %119 {strides = array<i32>} : memref<8x64xf32, #tpu.memory_space<vmem>>, vector<8x64xf32>,
      %c0_86 = arith.constant 0 : index
      %c0_87 = arith.constant 0 : index
      %123 = vector.load %arg25[%c0_86, %c0_87] : memref<8x64xf32, #tpu.memory_space<vmem>>, vector<8x64xf32>
      tpu.vector_store %arg25[%c0_86, %c0_87], %121 {strides = array<i32>} : memref<8x64xf32, #tpu.memory_space<vmem>>, vector<8x64xf32>,
      %c0_88 = arith.constant 0 : index
      %c0_89 = arith.constant 0 : index
      %124 = vector.load %arg18[%c0_88, %c0_89] : memref<64x256xf32, #tpu.memory_space<vmem>>, vector<64x256xf32>
      %cst_90 = arith.constant dense<0.000000e+00> : vector<8x256xf32>
      %125 = tpu.matmul %119, %124, %cst_90 {dimension_numbers = #tpu.dot_dimension_numbers<[1], [0], [0], [1], [0, 0, 1, 1], [], []>} : vector<8x64xf32>, vector<64x256xf32>, vector<8x256xf32> -> vector<8x256xf32>
      %126 = vector.extract_strided_slice %97 {offsets = [0, 256], sizes = [8, 256], strides = [1, 1]} : vector<8x512xf32> to vector<8x256xf32>
      %127 = arith.addf %125, %126 : vector<8x256xf32>
      %c0_91 = arith.constant 0 : index
      %c0_92 = arith.constant 0 : index
      %128 = vector.load %arg19[%c0_91, %c0_92] : memref<1x256xf32, #tpu.memory_space<vmem>>, vector<1x256xf32>
      %129 = vector.broadcast %128 : vector<1x256xf32> to vector<8x256xf32>
      %130 = arith.addf %127, %129 : vector<8x256xf32>
      %c0_93 = arith.constant 0 : index
      %c0_94 = arith.constant 0 : index
      %131 = vector.load %arg27[%c0_93, %c0_94] : memref<8x64xf32, #tpu.memory_space<vmem>>, vector<8x64xf32>
      %132 = arith.negf %130 : vector<8x256xf32>
      %133 = math.exp %132 : vector<8x256xf32>
      %cst_95 = arith.constant 1.000000e+00 : f32
      %134 = vector.broadcast %cst_95 : f32 to vector<8x256xf32>
      %135 = arith.addf %134, %133 : vector<8x256xf32>
      %136 = arith.divf %134, %135 : vector<8x256xf32>
      %137 = vector.extract_strided_slice %130 {offsets = [0, 128], sizes = [8, 64], strides = [1, 1]} : vector<8x256xf32> to vector<8x64xf32>
      %138 = math.tanh %137 : vector<8x64xf32>
      %139 = vector.extract_strided_slice %136 {offsets = [0, 64], sizes = [8, 64], strides = [1, 1]} : vector<8x256xf32> to vector<8x64xf32>
      %140 = arith.mulf %139, %131 : vector<8x64xf32>
      %141 = vector.extract_strided_slice %136 {offsets = [0, 0], sizes = [8, 64], strides = [1, 1]} : vector<8x256xf32> to vector<8x64xf32>
      %142 = arith.mulf %141, %138 : vector<8x64xf32>
      %143 = arith.addf %140, %142 : vector<8x64xf32>
      %144 = vector.extract_strided_slice %136 {offsets = [0, 192], sizes = [8, 64], strides = [1, 1]} : vector<8x256xf32> to vector<8x64xf32>
      %145 = math.tanh %143 : vector<8x64xf32>
      %146 = arith.mulf %144, %145 : vector<8x64xf32>
      %147 = arith.select %92, %146, %94 : vector<8x64xi1>, vector<8x64xf32>
      %c0_96 = arith.constant 0 : index
      %c0_97 = arith.constant 0 : index
      %148 = vector.load %arg26[%c0_96, %c0_97] : memref<8x64xf32, #tpu.memory_space<vmem>>, vector<8x64xf32>
      tpu.vector_store %arg26[%c0_96, %c0_97], %147 {strides = array<i32>} : memref<8x64xf32, #tpu.memory_space<vmem>>, vector<8x64xf32>,
      %c0_98 = arith.constant 0 : index
      %c0_99 = arith.constant 0 : index
      %149 = vector.load %arg27[%c0_98, %c0_99] : memref<8x64xf32, #tpu.memory_space<vmem>>, vector<8x64xf32>
      %150 = arith.select %92, %143, %149 : vector<8x64xi1>, vector<8x64xf32>
      %c0_100 = arith.constant 0 : index
      %c0_101 = arith.constant 0 : index
      %151 = vector.load %arg27[%c0_100, %c0_101] : memref<8x64xf32, #tpu.memory_space<vmem>>, vector<8x64xf32>
      tpu.vector_store %arg27[%c0_100, %c0_101], %150 {strides = array<i32>} : memref<8x64xf32, #tpu.memory_space<vmem>>, vector<8x64xf32>,
    }
    %c0_60 = arith.constant 0 : index
    %c0_61 = arith.constant 0 : index
    %73 = vector.load %arg26[%c0_60, %c0_61] : memref<8x64xf32, #tpu.memory_space<vmem>>, vector<8x64xf32>
    %c0_62 = arith.constant 0 : index
    %c0_63 = arith.constant 0 : index
    %74 = vector.load %arg20[%c0_62, %c0_63] : memref<1x64xf32, #tpu.memory_space<vmem>>, vector<1x64xf32>
    %75 = vector.broadcast %74 : vector<1x64xf32> to vector<8x64xf32>
    %76 = arith.mulf %73, %75 : vector<8x64xf32>
    %cst_64 = arith.constant dense<0.000000e+00> : vector<8xf32>
    %77 = vector.multi_reduction <add>, %76, %cst_64 [1] : vector<8x64xf32> to vector<8xf32>
    %78 = vector.shape_cast %77 : vector<8xf32> to vector<8x1xf32>
    %c0_65 = arith.constant 0 : index
    %c0_66 = arith.constant 0 : index
    %79 = vector.load %arg21[%c0_65, %c0_66] : memref<1x1xf32, #tpu.memory_space<vmem>>, vector<1x1xf32>
    %80 = vector.broadcast %79 : vector<1x1xf32> to vector<8x1xf32>
    %81 = arith.addf %78, %80 : vector<8x1xf32>
    %82 = arith.negf %81 : vector<8x1xf32>
    %83 = math.exp %82 : vector<8x1xf32>
    %cst_67 = arith.constant 1.000000e+00 : f32
    %84 = vector.broadcast %cst_67 : f32 to vector<8x1xf32>
    %85 = arith.addf %84, %83 : vector<8x1xf32>
    %86 = arith.divf %84, %85 : vector<8x1xf32>
    %c0_68 = arith.constant 0 : index
    %c0_69 = arith.constant 0 : index
    %87 = vector.load %arg22[%c0_68, %c0_69] : memref<8x1xf32, #tpu.memory_space<vmem>>, vector<8x1xf32>
    tpu.vector_store %arg22[%c0_68, %c0_69], %86 {strides = array<i32>} : memref<8x1xf32, #tpu.memory_space<vmem>>, vector<8x1xf32>,
    return
  }
  func.func @transform_0(%arg0: i32, %arg1: memref<2xi32, #tpu.memory_space<smem>>) -> (i32, i32) {
    %c0_i32 = arith.constant 0 : i32
    %c0_i32_0 = arith.constant 0 : i32
    return %arg0, %c0_i32 : i32, i32
  }
  func.func @transform_1(%arg0: i32, %arg1: memref<2xi32, #tpu.memory_space<smem>>) -> (i32, i32) {
    %c0_i32 = arith.constant 0 : i32
    %c0_i32_0 = arith.constant 0 : i32
    return %arg0, %c0_i32 : i32, i32
  }
  func.func @transform_2(%arg0: i32, %arg1: memref<2xi32, #tpu.memory_space<smem>>) -> (i32, i32) {
    %c0_i32 = arith.constant 0 : i32
    %c0_i32_0 = arith.constant 0 : i32
    %c0_i32_1 = arith.constant 0 : i32
    return %c0_i32, %c0_i32_0 : i32, i32
  }
  func.func @transform_3(%arg0: i32, %arg1: memref<2xi32, #tpu.memory_space<smem>>) -> (i32, i32) {
    %c0_i32 = arith.constant 0 : i32
    %c0_i32_0 = arith.constant 0 : i32
    %c0_i32_1 = arith.constant 0 : i32
    return %c0_i32, %c0_i32_0 : i32, i32
  }
  func.func @transform_4(%arg0: i32, %arg1: memref<2xi32, #tpu.memory_space<smem>>) -> (i32, i32) {
    %c0_i32 = arith.constant 0 : i32
    %c0_i32_0 = arith.constant 0 : i32
    %c0_i32_1 = arith.constant 0 : i32
    return %c0_i32, %c0_i32_0 : i32, i32
  }
  func.func @transform_5(%arg0: i32, %arg1: memref<2xi32, #tpu.memory_space<smem>>) -> (i32, i32) {
    %c0_i32 = arith.constant 0 : i32
    %c0_i32_0 = arith.constant 0 : i32
    %c0_i32_1 = arith.constant 0 : i32
    return %c0_i32, %c0_i32_0 : i32, i32
  }
  func.func @transform_6(%arg0: i32, %arg1: memref<2xi32, #tpu.memory_space<smem>>) -> (i32, i32) {
    %c0_i32 = arith.constant 0 : i32
    %c0_i32_0 = arith.constant 0 : i32
    %c0_i32_1 = arith.constant 0 : i32
    return %c0_i32, %c0_i32_0 : i32, i32
  }
  func.func @transform_7(%arg0: i32, %arg1: memref<2xi32, #tpu.memory_space<smem>>) -> (i32, i32) {
    %c0_i32 = arith.constant 0 : i32
    %c0_i32_0 = arith.constant 0 : i32
    %c0_i32_1 = arith.constant 0 : i32
    return %c0_i32, %c0_i32_0 : i32, i32
  }
  func.func @transform_8(%arg0: i32, %arg1: memref<2xi32, #tpu.memory_space<smem>>) -> (i32, i32) {
    %c0_i32 = arith.constant 0 : i32
    %c0_i32_0 = arith.constant 0 : i32
    %c0_i32_1 = arith.constant 0 : i32
    return %c0_i32, %c0_i32_0 : i32, i32
  }
  func.func @transform_9(%arg0: i32, %arg1: memref<2xi32, #tpu.memory_space<smem>>) -> (i32, i32) {
    %c0_i32 = arith.constant 0 : i32
    %c0_i32_0 = arith.constant 0 : i32
    %c0_i32_1 = arith.constant 0 : i32
    return %c0_i32, %c0_i32_0 : i32, i32
  }
  func.func @transform_10(%arg0: i32, %arg1: memref<2xi32, #tpu.memory_space<smem>>) -> (i32, i32) {
    %c0_i32 = arith.constant 0 : i32
    %c0_i32_0 = arith.constant 0 : i32
    %c0_i32_1 = arith.constant 0 : i32
    return %c0_i32, %c0_i32_0 : i32, i32
  }
  func.func @transform_11(%arg0: i32, %arg1: memref<2xi32, #tpu.memory_space<smem>>) -> (i32, i32) {
    %c0_i32 = arith.constant 0 : i32
    %c0_i32_0 = arith.constant 0 : i32
    %c0_i32_1 = arith.constant 0 : i32
    return %c0_i32, %c0_i32_0 : i32, i32
  }
  func.func @transform_12(%arg0: i32, %arg1: memref<2xi32, #tpu.memory_space<smem>>) -> (i32, i32) {
    %c0_i32 = arith.constant 0 : i32
    %c0_i32_0 = arith.constant 0 : i32
    %c0_i32_1 = arith.constant 0 : i32
    return %c0_i32, %c0_i32_0 : i32, i32
  }
  func.func @transform_13(%arg0: i32, %arg1: memref<2xi32, #tpu.memory_space<smem>>) -> (i32, i32) {
    %c0_i32 = arith.constant 0 : i32
    %c0_i32_0 = arith.constant 0 : i32
    %c0_i32_1 = arith.constant 0 : i32
    return %c0_i32, %c0_i32_0 : i32, i32
  }
  func.func @transform_14(%arg0: i32, %arg1: memref<2xi32, #tpu.memory_space<smem>>) -> (i32, i32) {
    %c0_i32 = arith.constant 0 : i32
    %c0_i32_0 = arith.constant 0 : i32
    %c0_i32_1 = arith.constant 0 : i32
    return %c0_i32, %c0_i32_0 : i32, i32
  }
  func.func @transform_15(%arg0: i32, %arg1: memref<2xi32, #tpu.memory_space<smem>>) -> (i32, i32) {
    %c0_i32 = arith.constant 0 : i32
    %c0_i32_0 = arith.constant 0 : i32
    %c0_i32_1 = arith.constant 0 : i32
    return %c0_i32, %c0_i32_0 : i32, i32
  }
  func.func @transform_16(%arg0: i32, %arg1: memref<2xi32, #tpu.memory_space<smem>>) -> (i32, i32) {
    %c0_i32 = arith.constant 0 : i32
    %c0_i32_0 = arith.constant 0 : i32
    %c0_i32_1 = arith.constant 0 : i32
    return %c0_i32, %c0_i32_0 : i32, i32
  }
  func.func @transform_17(%arg0: i32, %arg1: memref<2xi32, #tpu.memory_space<smem>>) -> (i32, i32) {
    %c0_i32 = arith.constant 0 : i32
    %c0_i32_0 = arith.constant 0 : i32
    %c0_i32_1 = arith.constant 0 : i32
    return %c0_i32, %c0_i32_0 : i32, i32
  }
  func.func @transform_18(%arg0: i32, %arg1: memref<2xi32, #tpu.memory_space<smem>>) -> (i32, i32) {
    %c0_i32 = arith.constant 0 : i32
    %c0_i32_0 = arith.constant 0 : i32
    %c0_i32_1 = arith.constant 0 : i32
    return %c0_i32, %c0_i32_0 : i32, i32
  }
  func.func @transform_19(%arg0: i32, %arg1: memref<2xi32, #tpu.memory_space<smem>>) -> (i32, i32) {
    %c0_i32 = arith.constant 0 : i32
    %c0_i32_0 = arith.constant 0 : i32
    %c0_i32_1 = arith.constant 0 : i32
    return %c0_i32, %c0_i32_0 : i32, i32
  }
  func.func @transform_20(%arg0: i32, %arg1: memref<2xi32, #tpu.memory_space<smem>>) -> (i32, i32) {
    %c0_i32 = arith.constant 0 : i32
    %c0_i32_0 = arith.constant 0 : i32
    return %arg0, %c0_i32 : i32, i32
  }
}

</mosaic_0001>

<bundles_post_ra>
// kernel: tpu_custom_call.1
= control target key start
LH: loop header
LB: loop body
LE: loop exit
PB: predicated region body
PF: predicated region fallthrough
CT: control target
= control target key end

     0   :  { %s4835_s0 = inlined_call_operand.hbm [shape: s32[2], index: 0, kind: input, shape index: {}]   ;;  %s4836_s1 = inlined_call_operand.hbm [shape: f32[16,512], index: 1, kind: input, shape index: {}]   ;;  %s4837_s2 = inlined_call_operand.vmem [shape: f32[16,1], index: 2, kind: input, shape index: {}]   ;;  %s4838_s3 = inlined_call_operand.hbm [shape: bf16[512,256], index: 3, kind: input, shape index: {}]   ;;  %s4839_s4 = inlined_call_operand.hbm [shape: bf16[512,256], index: 4, kind: input, shape index: {}]   ;;  %s4840_s5 = inlined_call_operand.hbm [shape: f32[1,256], index: 5, kind: input, shape index: {}]   ;;  %s4841_s6 = inlined_call_operand.vmem [shape: bf16[256,128], index: 6, kind: input, shape index: {}]   ;;  %s4842_s7 = inlined_call_operand.vmem [shape: bf16[256,128], index: 7, kind: input, shape index: {}]   ;;  %s4843_s8 = inlined_call_operand.vmem [shape: f32[1,128], index: 8, kind: input, shape index: {}]   ;;  %s4844_s9 = inlined_call_operand.vmem [shape: bf16[128,64], index: 9, kind: input, shape index: {}]   ;;  %s4845_s10 = inlined_call_operand.vmem [shape: bf16[128,64], index: 10, kind: input, shape index: {}]   ;;  %s4846_s11 = inlined_call_operand.hbm [shape: f32[1,64], index: 11, kind: input, shape index: {}]   ;;  %s4847_s12 = inlined_call_operand.vmem [shape: bf16[64,32], index: 12, kind: input, shape index: {}]   ;;  %s4848_s13 = inlined_call_operand.vmem [shape: f32[1,32], index: 13, kind: input, shape index: {}]   ;;  %s4849_s14 = inlined_call_operand.hbm [shape: bf16[32,512], index: 14, kind: input, shape index: {}]   ;;  %s4850_s15 = inlined_call_operand.vmem [shape: f32[1,512], index: 15, kind: input, shape index: {}]   ;;  %s4851_s16 = inlined_call_operand.hbm [shape: f32[128,512], index: 16, kind: input, shape index: {}]   ;;  %s4852_s17 = inlined_call_operand.hbm [shape: f32[64,256], index: 17, kind: input, shape index: {}]   ;;  %s4853_s18 = inlined_call_operand.vmem [shape: f32[1,256], index: 18, kind: input, shape index: {}]   ;;  %s4854_s19 = inlined_call_operand.vmem [shape: f32[1,64], index: 19, kind: input, shape index: {}]   ;;  %s4855_s21 = inlined_call_operand.vmem [shape: f32[16,1], index: 21, kind: output, shape index: {}]   ;;  %s4856_s20 = inlined_call_operand.<no memory space> [shape: f32[1,1], index: 20, kind: input, shape index: {}]  }
   0x1   :  { %4862 = sst [smem:[#allocation29_spill]] %s4835_s0  ;;  %v28_v0 = vstv %s4856_s20 }
   0x2   :  { %4863 = sst [smem:[#allocation30_spill]] %s4836_s1  ;;  %29 = vst [vmem:[#allocation9] sm:$0x1] %v28_v0 }
   0x3   :  { %4864 = sst [smem:[#allocation31_spill]] %s4837_s2  ;;  %s4202_s2 = smov [#allocation8]  }
   0x4   :  { %4865 = sst [smem:[#allocation32_spill]] %s4838_s3 }
   0x5   :  { %4866 = sst [smem:[#allocation33_spill]] %s4839_s4 }
   0x6   :  { %4867 = sst [smem:[#allocation34_spill]] %s4840_s5 }
   0x7   :  { %4868 = sst [smem:[#allocation35_spill]] %s4846_s11 }
   0x8   :  { %4869 = sst [smem:[#allocation36_spill]] %s4848_s13 }
   0x9   :  { %4870 = sst [smem:[#allocation37_spill]] %s4849_s14 }
   0xa   :  { %4871 = sst [smem:[#allocation38_spill]] %s4850_s15 }
   0xb   :  { %4872 = sst [smem:[#allocation39_spill]] %s4853_s18 }
   0xc   :  { %4873 = sst [smem:[#allocation40_spill]] %s4854_s19 }
   0xd   :  { %s4874_s15 = sld [smem:[#allocation29_spill]] }
  0x13   :  { %27 = dma.hbm_to_smem %s4874_s15, 16, %s4202_s2, [#allocation7] }
  0x14   :  { %4160 = dma.done.wait [#allocation7], 16 }
  0x15   :  { %4161 = vsyncadd [#allocation7], 4294967280 }
  0x16   :  { %31 = sfence }
  0x17   :  { %32 = vsyncpa [#allocation11], 0 }
  0x18   :  { %34 = vsyncpa [#allocation11 + $0x1], 0 }
  0x19   :  { %35 = vsyncpa [#allocation13], 0 }
  0x1a   :  { %36 = vsyncpa [#allocation16], 0 }
  0x1b   :  { %37 = vsyncpa [#allocation19], 0 }
  0x1c   :  { %38 = vsyncpa [#allocation22], 0  ;;  %s4338_s28 = smov 0   ;;  %s4340_s29 = smov 0  }
  0x1d   :  { %s4342_s0 = smov 0   ;;  %s4344_s15 = smov 0  }
  0x1e LB: > { %s4203_s20 = smov [#allocation12]   ;;  %s4359_s30 = sadd.s32 4294967295, %s4196_s15   ;;  %s4196_s15 = sphi %s4344_s15, %s4905_s15   ;;  %s4192_s0 = sphi %s4342_s0, %s4904_s0   ;;  %s4188_s29 = sphi %s4340_s29, %s4903_s29   ;;  %s4184_s28 = sphi %s4338_s28, %s4902_s28  }
  0x1f   : > { %s517_s4 = sshll.u32 %s4203_s20, 4  ;;  %p3153_p0 = scmp.ge.s32.totalorder %s4196_s15, 1  ;;  %s518_s4 = int_to_ptr.vmem [resolvable:$true] %s517_s4 }
  0x20   : > { %p4859_p1 = scmp.eq.s32.totalorder %s4359_s30, 0  ;;  %p505_p2 = scmp.lt.s32.totalorder %s4196_s15, 3 }
  0x21   : > { %s4204_s22 = smov [#allocation15]   ;;  %s4205_s24 = smov [#allocation18]  }
  0x22   : > { %p4364_p3 = pnand %p3153_p0, %p505_p2  ;;  %s544_s23 = sshll.u32 %s4204_s22, 4  ;;  %s545_s23 = int_to_ptr.vmem [resolvable:$true] %s544_s23 }
  0x23   : > { %s586_s2 = sshll.u32 %s4205_s24, 4  ;;  %s3941_s26 = scalar_lea.vmem %s518_s4, 8192  ;;  %s4376_s2 = int_to_ptr.vmem [resolvable:$true] %s586_s2 }
  0x24   : > { %s4875_s5 = scalar_select %p4364_p3, 1, 0 }
  0x25   : > { %p3537_p4 = pneg %p4364_p3  ;;  %p3942_p7 = scmp.ne.s32.totalorder %s518_s4, %s3941_s26 }
  0x26   : > { %p3949_p10 = scmp.lt.s32.totalorder %s518_s4, %s518_s4  ;;  %p3950_p11 = scmp.lt.s32.totalorder %s3941_s26, %s3941_s26 }
  0x27   : > { %p4372_p5 = pnand %p3537_p4, %p4859_p1 }
  0x28   : > { %p3951_p12 = por %p3950_p11, %p3949_p10 }
  0x29   : > { %p4380_p6 = pneg %p4372_p5 }
  0x2b   : > { %p3944_p8 = pnand %p3942_p7, %p4380_p6 }
  0x2d   : > { %p3945_p9 = pneg %p3944_p8 }
  0x2f   : > { %p3952_p13 = pnand %p3951_p12, %p3945_p9 }
  0x31   : > { %3955 = shalt.err (!%p3952_p13)
}
  0x32   : > { %s4206_s27 = smov 128   ;;  %s4207_s3 = smov 8  }
  0x33   : > { %s4878_s24 = sld [smem:[#allocation32_spill]]  ;;  %s3967_s19 = scalar_lea.vmem %s545_s23, 32 }
  0x34   : > { %p3968_p0 = scmp.ne.s32.totalorder %s545_s23, %s3967_s19  ;;  %p3975_p7 = scmp.lt.s32.totalorder %s545_s23, %s545_s23 }
  0x35   : > { %p3976_p8 = scmp.lt.s32.totalorder %s3967_s19, %s3967_s19 }
  0x36   : > { %p3970_p2 = pnand %p3968_p0, %p4380_p6 }
  0x37   : > { %p3977_p9 = por %p3976_p8, %p3975_p7 }
  0x38   : > { %p3971_p4 = pneg %p3970_p2 }
  0x39   : > { %3540 = dma.hbm_to_vmem [thread:$0]  (!%p4372_p5), %s4878_s24, 8192, %s518_s4, [#allocation13], %s4206_s27, %s4206_s27, %s4207_s3  }
  0x3a   : > { %p3978_p10 = pnand %p3977_p9, %p3971_p4 }
  0x3c   : > { %3981 = shalt.err (!%p3978_p10)
}
  0x3d   : > { %s4879_s13 = sld [smem:[#allocation34_spill]]  ;;  %s3993_s4 = scalar_lea.vmem %s4376_s2, 1024 }
  0x3e   : > { %p3994_p11 = scmp.ne.s32.totalorder %s4376_s2, %s3993_s4  ;;  %p4001_p0 = scmp.lt.s32.totalorder %s4376_s2, %s4376_s2 }
  0x3f   : > { %p4002_p2 = scmp.lt.s32.totalorder %s3993_s4, %s3993_s4 }
  0x40   : > { %p3996_p12 = pnand %p3994_p11, %p4380_p6 }
  0x41   : > { %p4003_p4 = por %p4002_p2, %p4001_p0 }
  0x42   : > { %p3997_p13 = pneg %p3996_p12 }
  0x43   : > { %3546 = dma.hbm_to_vmem [thread:$0]  (!%p4372_p5), %s4879_s13, 32, %s545_s23, [#allocation16]  }
  0x44   : > { %p4004_p7 = pnand %p4003_p4, %p3997_p13 }
  0x46   : > { %4007 = shalt.err (!%p4004_p7)
}
  0x47   : > { %s4858_s19 = smov 256   ;;  %s4209_s18 = smov 16  }
  0x48   : > { %s4880_s14 = sld [smem:[#allocation37_spill]]  ;;  %s4210_s20 = smov [#allocation14]  }
  0x49   : > { %s530_s22 = sshll.u32 %s4210_s20, 4  ;;  %s4211_s24 = smov [#allocation17]   ;;  %s531_s22 = int_to_ptr.vmem [resolvable:$true] %s530_s22 }
  0x4a   : > { %s570_s26 = sshll.u32 %s4211_s24, 4  ;;  %s4019_s4 = scalar_lea.vmem %s531_s22, 8192  ;;  %s571_s26 = int_to_ptr.vmem [resolvable:$true] %s570_s26 }
  0x4b   : > { %p4020_p8 = scmp.ne.s32.totalorder %s531_s22, %s4019_s4  ;;  %p4027_p11 = scmp.lt.s32.totalorder %s531_s22, %s531_s22 }
  0x4c   : > { %p4028_p12 = scmp.lt.s32.totalorder %s4019_s4, %s4019_s4 }
  0x4d   : > { %p4022_p9 = pnand %p4020_p8, %p4380_p6 }
  0x4e   : > { %3552 = dma.hbm_to_vmem [thread:$0]  (!%p4372_p5), %s4880_s14, 1024, %s4376_s2, [#allocation19], %s4858_s19, %s4858_s19, %s4209_s18  }
  0x4f   : > { %p4023_p10 = pneg %p4022_p9  ;;  %p4029_p13 = por %p4028_p12, %p4027_p11 }
  0x51   : > { %p4030_p0 = pnand %p4029_p13, %p4023_p10 }
  0x53   : > { %4033 = shalt.err (!%p4030_p0)
}
  0x54   : > { %s4881_s23 = sld [smem:[#allocation33_spill]]  ;;  %s4045_s20 = scalar_lea.vmem %s571_s26, 16 }
  0x55   : > { %p4046_p2 = scmp.ne.s32.totalorder %s571_s26, %s4045_s20  ;;  %s4052_s24 = scalar_lea.vmem %s571_s26, 32 }
  0x56   : > { %p4053_p8 = scmp.lt.s32.totalorder %s571_s26, %s571_s26  ;;  %p4054_p9 = scmp.lt.s32.totalorder %s4052_s24, %s4045_s20 }
  0x57   : > { %p4048_p4 = pnand %p4046_p2, %p4380_p6 }
  0x58   : > { %p4055_p10 = por %p4054_p9, %p4053_p8 }
  0x59   : > { %p4049_p7 = pneg %p4048_p4 }
  0x5a   : > { %3543 = dma.hbm_to_vmem [thread:$0]  (!%p4372_p5), %s4881_s23, 8192, %s531_s22, [#allocation13], %s4206_s27, %s4206_s27, %s4207_s3  }
  0x5b   : > { %p4056_p11 = pnand %p4055_p10, %p4049_p7 }
  0x5d   : > { %4059 = shalt.err (!%p4056_p11)
}
  0x5e   : > { %s4882_s11 = sld [smem:[#allocation35_spill]]  ;;  %s4212_s27 = smov [#allocation20]  }
  0x5f   : > { %s602_s3 = sshll.u32 %s4212_s27, 4  ;;  %s603_s3 = int_to_ptr.vmem [resolvable:$true] %s602_s3 }
  0x60   : > { %s4071_s22 = scalar_lea.vmem %s603_s3, 8192  ;;  %p4079_p2 = scmp.lt.s32.totalorder %s603_s3, %s603_s3 }
  0x61   : > { %p4072_p12 = scmp.ne.s32.totalorder %s603_s3, %s4071_s22  ;;  %p4080_p4 = scmp.lt.s32.totalorder %s4071_s22, %s4071_s22 }
  0x63   : > { %p4074_p13 = pnand %p4072_p12, %p4380_p6  ;;  %p4081_p8 = por %p4080_p4, %p4079_p2 }
  0x64   : > { %3549 = dma.hbm_to_vmem [thread:$0]  (!%p4372_p5), %s4882_s11, 16, %s571_s26, [#allocation16]  }
  0x65   : > { %p4075_p0 = pneg %p4074_p13 }
  0x67   : > { %p4082_p7 = pnand %p4081_p8, %p4075_p0 }
  0x69   : > { %4085 = shalt.err (!%p4082_p7)
}
  0x6a   : > { %s4213_s2 = smov 512   ;;  %s4214_s13 = smov 32  }
  0x6b   : > { %3555 = dma.hbm_to_vmem [thread:$0]  (!%p4372_p5), %s4851_s16, 8192, %s603_s3, [#allocation19], %s4213_s2, %s4213_s2, %s4214_s13  }
  0x6c   : > { %s4215_s23 = smov [#allocation21]  }
  0x6d   : > { %s615_s20 = sshll.u32 %s4215_s23, 4  ;;  %s616_s20 = int_to_ptr.vmem [resolvable:$true] %s615_s20 }
  0x6e   : > { %s4097_s24 = scalar_lea.vmem %s616_s20, 2048  ;;  %p4105_p12 = scmp.lt.s32.totalorder %s616_s20, %s616_s20 }
  0x6f   : > { %p4098_p9 = scmp.ne.s32.totalorder %s616_s20, %s4097_s24  ;;  %p4106_p13 = scmp.lt.s32.totalorder %s4097_s24, %s4097_s24 }
  0x71   : > { %p4100_p10 = pnand %p4098_p9, %p4380_p6  ;;  %p4107_p0 = por %p4106_p13, %p4105_p12 }
  0x73   : > { %p4101_p11 = pneg %p4100_p10 }
  0x75   : > { %p4108_p2 = pnand %p4107_p0, %p4101_p11 }
  0x77   : > { %4111 = shalt.err (!%p4108_p2)
}
  0x78   : > { %s4883_s4 = smov 256   ;;  %s4451_s1 = sadd.s32 1, %s4196_s15  }
  0x79   : > { %3558 = dma.hbm_to_vmem [thread:$0]  (!%p4372_p5), %s4852_s17, 2048, %s616_s20, [#allocation22], %s4883_s4, %s4883_s4, %s4209_s18  }
  0x7a   : > { %s48_s25 = ssub.s32 %s4196_s15, %s4451_s1  ;;  %s51_s22 = sadd.s32 1, %s4192_s0 }
  0x7b   : > { %p49_p6 = scmp.eq.s32.totalorder %s48_s25, 0  ;;  %p58_p4 = scmp.ne.s32.totalorder %s4192_s0, %s4188_s29 }
  0x7c   : > { %p59_p8 = scmp.eq.s32.totalorder %s4196_s15, 0  ;;  %p64_p7 = scmp.ne.s32.totalorder %s4188_s29, %s4184_s28 }
  0x7d   : > { %s4462_s2 = scalar_select %p49_p6, %s4192_s0, %s51_s22  }
  0x7e   : > { %p60_p9 = por %p59_p8, %p58_p4  ;;  %p4466_p10 = por %p4859_p1, %p64_p7 }
  0x7f   : > { %p3570_p11 = scmp.lt.s32.totalorder %s4196_s15, 2  ;;  %s638_s19 = sand.u32 1, %s4192_s0  }
  0x80   : > { %s4884_s13 = scalar_select %p4466_p10, 1, 0 }
  0x81   : > { %s3162_s18 = sshll.u32 %s638_s19, 5  ;;  %s3383_s26 = sshll.u32 %s4196_s15, 9 }
  0x82   : > { %s4885_s24 = sld [smem:[#allocation30_spill]]  ;;  %s642_s28 = scalar_lea.vmem [#allocation10], %s3162_s18 }
  0x83   : > { %s650_s27 = sshll.u32 %s642_s28, 4  ;;  %p4478_p5 = pnand %p3570_p11, %p60_p9  ;;  %s651_s27 = int_to_ptr.vmem [resolvable:$true] %s650_s27 }
  0x84   : > { %s639_s25 = scalar_lea.sflag [#allocation11], %s638_s19 }
  0x85   : > { %p4114_p13 = pneg %p4478_p5 }
  0x88   : > { %s4476_s4 = scalar_lea.hbm %s4885_s24, %s3383_s26  ;;  %s4117_s23 = scalar_lea.hbm %s4885_s24, 1024 }
  0x89   : > { %s4112_s22 = scalar_lea.hbm %s4476_s4, 512  ;;  %p4118_p6 = scmp.lt.s32.totalorder %s4476_s4, %s4885_s24 }
  0x8a   : > { %p4113_p12 = scmp.ne.s32.totalorder %s4476_s4, %s4112_s22  ;;  %p4119_p4 = scmp.lt.s32.totalorder %s4117_s23, %s4112_s22 }
  0x8c   : > { %p4115_p0 = pnand %p4114_p13, %p4113_p12  ;;  %p4120_p8 = por %p4119_p4, %p4118_p6 }
  0x8e   : > { %p4116_p2 = pneg %p4115_p0 }
  0x90   : > { %p4121_p7 = pnand %p4120_p8, %p4116_p2 }
  0x92   : > { %4124 = shalt.err (!%p4121_p7)
}
  0x93   : > { %s4125_s28 = scalar_lea.vmem %s651_s27, 512  ;;  %s4216_s19 = smov [#allocation10]  }
  0x94   : > { %p4126_p9 = scmp.ne.s32.totalorder %s651_s27, %s4125_s28  ;;  %s4130_s11 = sshll.u32 %s4216_s19, 4  ;;  %s4131_s11 = int_to_ptr.vmem [resolvable:$false] %s4130_s11 }
  0x95   : > { %s4132_s14 = scalar_lea.vmem %s4131_s11, 1024  ;;  %p4133_p12 = scmp.lt.s32.totalorder %s651_s27, %s4131_s11 }
  0x96   : > { %p4128_p11 = pnand %p4126_p9, %p4114_p13  ;;  %p4134_p0 = scmp.lt.s32.totalorder %s4132_s14, %s4125_s28 }
  0x98   : > { %p4129_p1 = pneg %p4128_p11  ;;  %p4135_p10 = por %p4134_p0, %p4133_p12 }
  0x9a   : > { %p4136_p3 = pnand %p4135_p10, %p4129_p1 }
  0x9c   : > { %4139 = shalt.err (!%p4136_p3)
}
  0x9d   : > { %3562 = dma.hbm_to_vmem [thread:$0]  (!%p4478_p5), %s4476_s4, 512, %s651_s27, %s639_s25  }
  0x9e   : > { %p4887_p2 = scmp.ne.s32.totalorder %s4875_s5, 0 }
  0x9f   : > { %s668_s22 = sand.u32 (!%p4887_p2), 1, %s4188_s29   ;;  %p4888_p13 = scmp.ne.s32.totalorder (!%p4887_p2), %s4884_s13, 0 }
  0xa0   : > { %666 = sbr.rel (%p4887_p2) target bundleno = 2585 (0xa19), region = 100  ;;  %s3166_s15 = sshll.u32 (!%p4887_p2), %s668_s22, 5 }
  0xa1   : > { %s669_s26 = scalar_lea.sflag (!%p4887_p2), [#allocation11], %s668_s22  ;;  %s4499_s23 = scalar_lea.vmem (!%p4887_p2), [#allocation10], %s3166_s15 }
  0xa5   : > { %4163 = dma.done.wait (%p4888_p13), %s669_s26, 512  }
  0xa6   : > { %4165 = vsyncadd (%p4888_p13), %s669_s26, 4294966784  ;;  %p4889_p1 = scmp.eq.s32.totalorder %s4359_s30, 0 }
  0xa8   : > { %4167 = dma.done.wait (%p4889_p1), [#allocation13], 16384   ;;  %p4890_p3 = pmov %p4889_p1 }
  0xa9   : > { %p4891_p10 = pmov %p4889_p1 }
  0xaa   : > { %4169 = vsyncadd (%p4890_p3), [#allocation13], 4294950912 }
  0xab   : > { %4171 = dma.done.wait (%p4891_p10), [#allocation16], 48   ;;  %p4892_p5 = pmov %p4889_p1 }
  0xac   : > { %p4893_p6 = pmov %p4889_p1 }
  0xad   : > { %4173 = vsyncadd (%p4892_p5), [#allocation16], 4294967248 }
  0xae   : > { %4175 = dma.done.wait (%p4893_p6), [#allocation19], 9216   ;;  %p4894_p4 = pmov %p4889_p1 }
  0xaf   : > { %p4895_p8 = pmov %p4889_p1 }
  0xb0   : > { %4177 = vsyncadd (%p4894_p4), [#allocation19], 4294958080 }
  0xb1   : > { %4179 = dma.done.wait (%p4895_p8), [#allocation22], 2048   ;;  %p4896_p7 = pmov %p4889_p1 }
  0xb2   : > { %s4522_s11 = sld [smem:[#allocation8 + %s4359_s30]]  ;;  %v3638_v1 = vld [vmem:[#allocation12 + $0x74] ss:$8 sps:$4 sm:$0xff]   ;;  %v3642_v3 = vld [vmem:[#allocation12 + $0x70] ss:$8 sps:$4 sm:$0xff]   ;;  %v770_v47 = vld [vmem:[%s4499_s23 + $0x8] sm:$0xff] }
  0xb3   : > { %4181 = vsyncadd (%p4896_p7), [#allocation22], 4294965248  ;;  %v3640_v2 = vld [vmem:[#allocation12 + $0x174] ss:$8 sps:$4 sm:$0xff]   ;;  %1161 = vmatprep.subr.bf16.mxu0 %v3638_v1  ;;  %v3643_v4 = vld [vmem:[#allocation12 + $0x170] ss:$8 sps:$4 sm:$0xff]   ;;  %v4529_v50 = vpack.c.bf16 %v770_v47, %v770_v47 }
  0xb4   : > { %1202 = vmatprep.subr.bf16.mxu1 %v3640_v2  ;;  %v3644_v5 = vld [vmem:[#allocation12 + $0x64] ss:$8 sps:$4 sm:$0xff]   ;;  %1162 = vmatpush1.bf16.msra.mxu0 %v3642_v3  ;;  %v3648_v7 = vld [vmem:[#allocation12 + $0x60] ss:$8 sps:$4 sm:$0xff]   ;;  %v3650_v9 = vld [vmem:[#allocation12 + $0x54] ss:$8 sps:$4 sm:$0xff]  }
  0xb5   : > { %1203 = vmatpush1.bf16.msra.mxu1 %v3643_v4  ;;  %v3646_v6 = vld [vmem:[#allocation12 + $0x164] ss:$8 sps:$4 sm:$0xff]   ;;  %1163 = vmatprep.subr.bf16.mxu0 %v3644_v5  ;;  %v3649_v8 = vld [vmem:[#allocation12 + $0x160] ss:$8 sps:$4 sm:$0xff]   ;;  %v3652_v10 = vld [vmem:[#allocation12 + $0x154] ss:$8 sps:$4 sm:$0xff]  }
  0xb6   : > { %1204 = vmatprep.subr.bf16.mxu1 %v3646_v6  ;;  %v3654_v11 = vld [vmem:[#allocation12 + $0x50] ss:$8 sps:$4 sm:$0xff]   ;;  %v3656_v13 = vld [vmem:[#allocation12 + $0x44] ss:$8 sps:$4 sm:$0xff]   ;;  %v3660_v15 = vld [vmem:[#allocation12 + $0x40] ss:$8 sps:$4 sm:$0xff]   ;;  %1193 = vmatprep.mubr.bf16.mxu0 %v4529_v50 }
  0xb7   : > { %v3655_v12 = vld [vmem:[#allocation12 + $0x150] ss:$8 sps:$4 sm:$0xff]   ;;  %v3658_v14 = vld [vmem:[#allocation12 + $0x144] ss:$8 sps:$4 sm:$0xff]   ;;  %v3661_v16 = vld [vmem:[#allocation12 + $0x140] ss:$8 sps:$4 sm:$0xff]  }
  0xb8   : > { %p2552_p9 = scmp.lt.s32.totalorder %s4522_s11, 2  ;;  %1164 = vmatpush1.bf16.msra.mxu0 %v3648_v7  ;;  %v3662_v17 = vld [vmem:[#allocation12 + $0x34] ss:$8 sps:$4 sm:$0xff]   ;;  %v3666_v19 = vld [vmem:[#allocation12 + $0x30] ss:$8 sps:$4 sm:$0xff]   ;;  %v769_v5 = vld [vmem:[%s4499_s23] sm:$0xff] }
  0xb9   : > { %1205 = vmatpush1.bf16.msra.mxu1 %v3649_v8  ;;  %1165 = vmatprep.subr.bf16.mxu0 %v3650_v9  ;;  %v3664_v18 = vld [vmem:[#allocation12 + $0x134] ss:$8 sps:$4 sm:$0xff]   ;;  %v3667_v20 = vld [vmem:[#allocation12 + $0x130] ss:$8 sps:$4 sm:$0xff]   ;;  %v3668_v21 = vld [vmem:[#allocation12 + $0x24] ss:$8 sps:$4 sm:$0xff]   ;;  %v4535_v9 = vpack.c.bf16 %v769_v5, %v769_v5 }
  0xba   : > { %s4526_s14 = scalar_select %p2552_p9, %s4522_s11, 2  ;;  %1206 = vmatprep.subr.bf16.mxu1 %v3652_v10  ;;  %v3670_v22 = vld [vmem:[#allocation12 + $0x124] ss:$8 sps:$4 sm:$0xff]   ;;  %v3672_v23 = vld [vmem:[#allocation12 + $0x20] ss:$8 sps:$4 sm:$0xff]   ;;  %v772_v51 = vld [vmem:[%s4499_s23 + $0x18] sm:$0xff] }
  0xbb   : > { %v3673_v24 = vld [vmem:[#allocation12 + $0x120] ss:$8 sps:$4 sm:$0xff]   ;;  %v3674_v25 = vld [vmem:[#allocation12 + $0x14] ss:$8 sps:$4 sm:$0xff]   ;;  %v3678_v27 = vld [vmem:[#allocation12 + $0x10] ss:$8 sps:$4 sm:$0xff]   ;;  %v776_v53 = vpack.c.bf16 %v772_v51, %v772_v51 }
  0xbc   : > { %1166 = vmatpush1.bf16.msra.mxu0 %v3654_v11  ;;  %v3676_v26 = vld [vmem:[#allocation12 + $0x114] ss:$8 sps:$4 sm:$0xff]   ;;  %v3679_v28 = vld [vmem:[#allocation12 + $0x110] ss:$8 sps:$4 sm:$0xff]   ;;  %v3680_v29 = vld [vmem:[#allocation12 + $0x4] ss:$8 sps:$4 sm:$0xff]  }
  0xbd   : > { %1207 = vmatpush1.bf16.msra.mxu1 %v3655_v12  ;;  %1167 = vmatprep.subr.bf16.mxu0 %v3656_v13  ;;  %v3682_v30 = vld [vmem:[#allocation12 + $0x104] ss:$8 sps:$4 sm:$0xff]   ;;  %v3684_v31 = vld [vmem:[#allocation12] ss:$8 sps:$4 sm:$0xff]   ;;  %v3686_v33 = vld [vmem:[#allocation12 + $0xf4] ss:$8 sps:$4 sm:$0xff]  }
  0xbe   : > { %1208 = vmatprep.subr.bf16.mxu1 %v3658_v14  ;;  %v3685_v32 = vld [vmem:[#allocation12 + $0x100] ss:$8 sps:$4 sm:$0xff]   ;;  %v3688_v34 = vld [vmem:[#allocation12 + $0x1f4] ss:$8 sps:$4 sm:$0xff]   ;;  %v3690_v35 = vld [vmem:[#allocation12 + $0xf0] ss:$8 sps:$4 sm:$0xff]   ;;  %1234 = vmatprep.mubr.bf16.mxu1 %v776_v53 }
  0xbf   : > { %v3691_v36 = vld [vmem:[#allocation12 + $0x1f0] ss:$8 sps:$4 sm:$0xff]   ;;  %v3692_v37 = vld [vmem:[#allocation12 + $0xe4] ss:$8 sps:$4 sm:$0xff]   ;;  %v3696_v39 = vld [vmem:[#allocation12 + $0xe0] ss:$8 sps:$4 sm:$0xff]  }
  0xc0   : > { %1168 = vmatpush1.bf16.msra.mxu0 %v3660_v15  ;;  %v3694_v38 = vld [vmem:[#allocation12 + $0x1e4] ss:$8 sps:$4 sm:$0xff]   ;;  %v3697_v40 = vld [vmem:[#allocation12 + $0x1e0] ss:$8 sps:$4 sm:$0xff]   ;;  %v3698_v41 = vld [vmem:[#allocation12 + $0xd4] ss:$8 sps:$4 sm:$0xff]  }
  0xc1   : > { %1209 = vmatpush1.bf16.msra.mxu1 %v3661_v16  ;;  %1169 = vmatprep.subr.bf16.mxu0 %v3662_v17  ;;  %v3700_v42 = vld [vmem:[#allocation12 + $0x1d4] ss:$8 sps:$4 sm:$0xff]   ;;  %v3702_v43 = vld [vmem:[#allocation12 + $0xd0] ss:$8 sps:$4 sm:$0xff]   ;;  %v3704_v45 = vld [vmem:[#allocation12 + $0xc4] ss:$8 sps:$4 sm:$0xff]  }
  0xc2   : > { %1210 = vmatprep.subr.bf16.mxu1 %v3664_v18  ;;  %v3703_v44 = vld [vmem:[#allocation12 + $0x1d0] ss:$8 sps:$4 sm:$0xff]   ;;  %v3706_v46 = vld [vmem:[#allocation12 + $0x1c4] ss:$8 sps:$4 sm:$0xff]   ;;  %v3708_v48 = vld [vmem:[#allocation12 + $0xc0] ss:$8 sps:$4 sm:$0xff]  }
  0xc3   : > { %v3709_v49 = vld [vmem:[#allocation12 + $0x1c0] ss:$8 sps:$4 sm:$0xff]   ;;  %v3710_v52 = vld [vmem:[#allocation12 + $0xb4] ss:$8 sps:$4 sm:$0xff]   ;;  %v3714_v55 = vld [vmem:[#allocation12 + $0xb0] ss:$8 sps:$4 sm:$0xff]  }
  0xc4   : > { %1170 = vmatpush1.bf16.msra.mxu0 %v3666_v19  ;;  %v3712_v54 = vld [vmem:[#allocation12 + $0x1b4] ss:$8 sps:$4 sm:$0xff]   ;;  %v3715_v56 = vld [vmem:[#allocation12 + $0x1b0] ss:$8 sps:$4 sm:$0xff]   ;;  %v3716_v57 = vld [vmem:[#allocation12 + $0xa4] ss:$8 sps:$4 sm:$0xff]  }
  0xc5   : > { %1211 = vmatpush1.bf16.msra.mxu1 %v3667_v20  ;;  %1171 = vmatprep.subr.bf16.mxu0 %v3668_v21  ;;  %v3718_v58 = vld [vmem:[#allocation12 + $0x1a4] ss:$8 sps:$4 sm:$0xff]   ;;  %v3720_v59 = vld [vmem:[#allocation12 + $0xa0] ss:$8 sps:$4 sm:$0xff]   ;;  %v3722_v61 = vld [vmem:[#allocation12 + $0x94] ss:$8 sps:$4 sm:$0xff]  }
  0xc6   : > { %1212 = vmatprep.subr.bf16.mxu1 %v3670_v22  ;;  %v3721_v60 = vld [vmem:[#allocation12 + $0x1a0] ss:$8 sps:$4 sm:$0xff]   ;;  %v3724_v62 = vld [vmem:[#allocation12 + $0x194] ss:$8 sps:$4 sm:$0xff]   ;;  %v3726_v63 = vld [vmem:[#allocation12 + $0x90] ss:$8 sps:$4 sm:$0xff]  }
  0xc7   : > { %v3727_v0 = vld [vmem:[#allocation12 + $0x190] ss:$8 sps:$4 sm:$0xff]   ;;  %v3728_v1 = vld [vmem:[#allocation12 + $0x84] ss:$8 sps:$4 sm:$0xff]   ;;  %v3732_v3 = vld [vmem:[#allocation12 + $0x80] ss:$8 sps:$4 sm:$0xff]  }
  0xc8   : > { %1172 = vmatpush1.bf16.msra.mxu0 %v3672_v23  ;;  %v3730_v2 = vld [vmem:[#allocation12 + $0x184] ss:$8 sps:$4 sm:$0xff]   ;;  %v3733_v4 = vld [vmem:[#allocation12 + $0x180] ss:$8 sps:$4 sm:$0xff]   ;;  %v771_v6 = vld [vmem:[%s4499_s23 + $0x10] sm:$0xff]  ;;  %vm4218_vm0 = vmmov 0  }
  0xc9   : > { %1213 = vmatpush1.bf16.msra.mxu1 %v3673_v24  ;;  %1173 = vmatprep.subr.bf16.mxu0 %v3674_v25  ;;  %v3736_v7 = vld [vmem:[#allocation14 + $0x74] ss:$8 sps:$4 sm:$0xff]   ;;  %v4537_v10 = vpack.c.bf16 %v771_v6, %v771_v6  ;;  %v3734_v11 = vld [vmem:[#allocation14 + $0x70] ss:$8 sps:$4 sm:$0xff]   ;;  %v3742_v13 = vld [vmem:[#allocation14 + $0x64] ss:$8 sps:$4 sm:$0xff]  }
  0xca   : > { %1214 = vmatprep.subr.bf16.mxu1 %v3676_v26  ;;  %v3739_v8 = vld [vmem:[#allocation14 + $0x174] ss:$8 sps:$4 sm:$0xff]   ;;  %v3737_v12 = vld [vmem:[#allocation14 + $0x170] ss:$8 sps:$4 sm:$0xff]   ;;  %v3745_v14 = vld [vmem:[#allocation14 + $0x164] ss:$8 sps:$4 sm:$0xff]  }
  0xcb   : > { %v3740_v15 = vld [vmem:[#allocation14 + $0x60] ss:$8 sps:$4 sm:$0xff]   ;;  %v3748_v17 = vld [vmem:[#allocation14 + $0x54] ss:$8 sps:$4 sm:$0xff]   ;;  %v3746_v19 = vld [vmem:[#allocation14 + $0x50] ss:$8 sps:$4 sm:$0xff]  }
  0xcc   : > { %1174 = vmatpush1.bf16.msra.mxu0 %v3678_v27  ;;  %v3743_v16 = vld [vmem:[#allocation14 + $0x160] ss:$8 sps:$4 sm:$0xff]   ;;  %v3751_v18 = vld [vmem:[#allocation14 + $0x154] ss:$8 sps:$4 sm:$0xff]   ;;  %v3749_v20 = vld [vmem:[#allocation14 + $0x150] ss:$8 sps:$4 sm:$0xff]  }
  0xcd   : > { %1215 = vmatpush1.bf16.msra.mxu1 %v3679_v28  ;;  %1175 = vmatprep.subr.bf16.mxu0 %v3680_v29  ;;  %v3754_v21 = vld [vmem:[#allocation14 + $0x44] ss:$8 sps:$4 sm:$0xff]   ;;  %v3752_v23 = vld [vmem:[#allocation14 + $0x40] ss:$8 sps:$4 sm:$0xff]   ;;  %v3760_v25 = vld [vmem:[#allocation14 + $0x34] ss:$8 sps:$4 sm:$0xff]  }
  0xce   : > { %1216 = vmatprep.subr.bf16.mxu1 %v3682_v30  ;;  %v3757_v22 = vld [vmem:[#allocation14 + $0x144] ss:$8 sps:$4 sm:$0xff]   ;;  %v3755_v24 = vld [vmem:[#allocation14 + $0x140] ss:$8 sps:$4 sm:$0xff]   ;;  %v3763_v26 = vld [vmem:[#allocation14 + $0x134] ss:$8 sps:$4 sm:$0xff]  }
  0xcf   : > { %v3758_v27 = vld [vmem:[#allocation14 + $0x30] ss:$8 sps:$4 sm:$0xff]   ;;  %v3766_v29 = vld [vmem:[#allocation14 + $0x24] ss:$8 sps:$4 sm:$0xff]   ;;  %v3788_v47 = vld [vmem:[#allocation14 + $0xe0] ss:$8 sps:$4 sm:$0xff]  }
  0xd0   : > { %1176 = vmatpush1.bf16.msra.mxu0 %v3684_v31  ;;  %v3761_v28 = vld [vmem:[#allocation14 + $0x130] ss:$8 sps:$4 sm:$0xff]   ;;  %v3769_v30 = vld [vmem:[#allocation14 + $0x124] ss:$8 sps:$4 sm:$0xff]   ;;  %v3764_v31 = vld [vmem:[#allocation14 + $0x20] ss:$8 sps:$4 sm:$0xff]  }
  0xd1   : > { %1217 = vmatpush1.bf16.msra.mxu1 %v3685_v32  ;;  %1177 = vmatprep.subr.bf16.mxu0 %v3686_v33  ;;  %v3767_v32 = vld [vmem:[#allocation14 + $0x120] ss:$8 sps:$4 sm:$0xff]   ;;  %v3772_v33 = vld [vmem:[#allocation14 + $0x14] ss:$8 sps:$4 sm:$0xff]   ;;  %v3794_v51 = vld [vmem:[#allocation14 + $0xd0] ss:$8 sps:$4 sm:$0xff]  }
  0xd2   : > { %1218 = vmatprep.subr.bf16.mxu1 %v3688_v34  ;;  %v3775_v34 = vld [vmem:[#allocation14 + $0x114] ss:$8 sps:$4 sm:$0xff]   ;;  %v3826_v5 = vld [vmem:[#allocation14 + $0x84] ss:$8 sps:$4 sm:$0xff]   ;;  %vm2334_vm1 = vcmask 523264   ;;  %p760_p11 = scmp.lt.s32.totalorder %s4359_s30, 1 }
  0xd3   : > { %v3829_v6 = vld [vmem:[#allocation14 + $0x184] ss:$8 sps:$4 sm:$0xff]   ;;  %s4897_s15 = sld [smem:[#allocation31_spill]]  ;;  %vm2450_vm2 = vcmask 261120   ;;  %p3384_p12 = scmp.le.s32.totalorder %s4522_s11, 0 }
  0xd4   : > { %1178 = vmatpush2.bf16.msra.mxu0 %v3690_v35  ;;  %v3770_v35 = vld [vmem:[#allocation14 + $0x10] ss:$8 sps:$4 sm:$0xff]   ;;  %s4907_s30 = smov (!%p760_p11, %s4359_s30), 1  ;;  %s4898_s3 = sld [smem:[#allocation36_spill]] }
  0xd5   : > { %1219 = vmatpush2.bf16.msra.mxu1 %v3691_v36  ;;  %1179 = vmatprep.subr.bf16.mxu0 %v3692_v37  ;;  %v3773_v36 = vld [vmem:[#allocation14 + $0x110] ss:$8 sps:$4 sm:$0xff]   ;;  %v3778_v37 = vld [vmem:[#allocation14 + $0x4] ss:$8 sps:$4 sm:$0xff]   ;;  %s3174_s28 = sshll.u32 %s4907_s30, 3  ;;  %s4899_s20 = sld [smem:[#allocation38_spill]] }
  0xd6   : > { %1220 = vmatprep.subr.bf16.mxu1 %v3694_v38  ;;  %v3781_v38 = vld [vmem:[#allocation14 + $0x104] ss:$8 sps:$4 sm:$0xff]   ;;  %s4756_s13 = scalar_lea.vmem %s4855_s21, %s3174_s28  ;;  %s4771_s18 = smov (!%p3384_p12), 0  }
  0xd8   : > { %1180 = vmatpush2.bf16.msra.mxu0 %v3696_v39  ;;  %v3776_v39 = vld [vmem:[#allocation14] ss:$8 sps:$4 sm:$0xff]  }
  0xd9   : > { %1221 = vmatpush2.bf16.msra.mxu1 %v3697_v40  ;;  %1181 = vmatprep.subr.bf16.mxu0 %v3698_v41  ;;  %v3779_v40 = vld [vmem:[#allocation14 + $0x100] ss:$8 sps:$4 sm:$0xff]   ;;  %v3784_v41 = vld [vmem:[#allocation14 + $0xf4] ss:$8 sps:$4 sm:$0xff]   ;;  %s763_s26 = scalar_lea.vmem %s4897_s15, %s3174_s28 }
  0xda   : > { %1222 = vmatprep.subr.bf16.mxu1 %v3700_v42  ;;  %v3787_v42 = vld [vmem:[#allocation14 + $0x1f4] ss:$8 sps:$4 sm:$0xff]  }
  0xdc   : > { %1182 = vmatpush2.bf16.msra.mxu0 %v3702_v43  ;;  %v3782_v43 = vld [vmem:[#allocation14 + $0xf0] ss:$8 sps:$4 sm:$0xff]  }
  0xdd   : > { %1223 = vmatpush2.bf16.msra.mxu1 %v3703_v44  ;;  %1183 = vmatprep.subr.bf16.mxu0 %v3704_v45  ;;  %v3785_v44 = vld [vmem:[#allocation14 + $0x1f0] ss:$8 sps:$4 sm:$0xff]   ;;  %v3790_v45 = vld [vmem:[#allocation14 + $0xe4] ss:$8 sps:$4 sm:$0xff]  }
  0xde   : > { %1224 = vmatprep.subr.bf16.mxu1 %v3706_v46  ;;  %v3793_v46 = vld [vmem:[#allocation14 + $0x1e4] ss:$8 sps:$4 sm:$0xff]  }
  0xe0   : > { %1184 = vmatpush2.bf16.msra.mxu0 %v3708_v48  ;;  %v3791_v48 = vld [vmem:[#allocation14 + $0x1e0] ss:$8 sps:$4 sm:$0xff]  }
  0xe1   : > { %1225 = vmatpush2.bf16.msra.mxu1 %v3709_v49  ;;  %1185 = vmatprep.subr.bf16.mxu0 %v3710_v52  ;;  %v3796_v49 = vld [vmem:[#allocation14 + $0xd4] ss:$8 sps:$4 sm:$0xff]   ;;  %v3797_v52 = vld [vmem:[#allocation14 + $0x1d0] ss:$8 sps:$4 sm:$0xff]  }
  0xe2   : > { %1226 = vmatprep.subr.bf16.mxu1 %v3712_v54  ;;  %v3805_v54 = vld [vmem:[#allocation14 + $0x1c4] ss:$8 sps:$4 sm:$0xff]  }
  0xe4   : > { %1186 = vmatpush2.bf16.msra.mxu0 %v3714_v55  ;;  %v3800_v55 = vld [vmem:[#allocation14 + $0xc0] ss:$8 sps:$4 sm:$0xff]  }
  0xe5   : > { %1227 = vmatpush2.bf16.msra.mxu1 %v3715_v56  ;;  %1187 = vmatprep.subr.bf16.mxu0 %v3716_v57  ;;  %v3803_v56 = vld [vmem:[#allocation14 + $0x1c0] ss:$8 sps:$4 sm:$0xff]   ;;  %v3808_v57 = vld [vmem:[#allocation14 + $0xb4] ss:$8 sps:$4 sm:$0xff]  }
  0xe6   : > { %1228 = vmatprep.subr.bf16.mxu1 %v3718_v58  ;;  %v3811_v58 = vld [vmem:[#allocation14 + $0x1b4] ss:$8 sps:$4 sm:$0xff]  }
  0xe8   : > { %1188 = vmatpush2.bf16.msra.mxu0 %v3720_v59  ;;  %v3806_v59 = vld [vmem:[#allocation14 + $0xb0] ss:$8 sps:$4 sm:$0xff]  }
  0xe9   : > { %1229 = vmatpush2.bf16.msra.mxu1 %v3721_v60  ;;  %1189 = vmatprep.subr.bf16.mxu0 %v3722_v61  ;;  %v3809_v60 = vld [vmem:[#allocation14 + $0x1b0] ss:$8 sps:$4 sm:$0xff]   ;;  %v3814_v61 = vld [vmem:[#allocation14 + $0xa4] ss:$8 sps:$4 sm:$0xff]  }
  0xea   : > { %1230 = vmatprep.subr.bf16.mxu1 %v3724_v62  ;;  %v3817_v62 = vld [vmem:[#allocation14 + $0x1a4] ss:$8 sps:$4 sm:$0xff]  }
  0xec   : > { %1190 = vmatpush2.bf16.msra.mxu0 %v3726_v63  ;;  %v3812_v63 = vld [vmem:[#allocation14 + $0xa0] ss:$8 sps:$4 sm:$0xff]  }
  0xed   : > { %1231 = vmatpush2.bf16.msra.mxu1 %v3727_v0  ;;  %1191 = vmatprep.subr.bf16.mxu0 %v3728_v1  ;;  %v3815_v0 = vld [vmem:[#allocation14 + $0x1a0] ss:$8 sps:$4 sm:$0xff]   ;;  %v3820_v1 = vld [vmem:[#allocation14 + $0x94] ss:$8 sps:$4 sm:$0xff]  }
  0xee   : > { %1232 = vmatprep.subr.bf16.mxu1 %v3730_v2  ;;  %v3823_v2 = vld [vmem:[#allocation14 + $0x194] ss:$8 sps:$4 sm:$0xff]  }
  0xf0   : > { %1192 = vmatpush2.bf16.msra.mxu0 %v3732_v3  ;;  %v3818_v3 = vld [vmem:[#allocation14 + $0x90] ss:$8 sps:$4 sm:$0xff]  }
  0xf1   : > { %1233 = vmatpush2.bf16.msra.mxu1 %v3733_v4  ;;  %1627 = vmatprep.subr.bf16.mxu0 %v3736_v7  ;;  %v3821_v4 = vld [vmem:[#allocation14 + $0x190] ss:$8 sps:$4 sm:$0xff]   ;;  %v3824_v7 = vld [vmem:[#allocation14 + $0x80] ss:$8 sps:$4 sm:$0xff]  }
  0xf2   : > { %1668 = vmatprep.subr.bf16.mxu1 %v3739_v8  ;;  %v3827_v8 = vld [vmem:[#allocation14 + $0x180] ss:$8 sps:$4 sm:$0xff]  }
  0xf3   : > { %1194 = vmatmul.mubr.bf16.vlgmr.msra.gmra.mxu0 %v4535_v9 }
  0xf4   : > { %1235 = vmatmul.mubr.bf16.vlgmr.msra.gmra.mxu1 %v4537_v10  ;;  %1628 = vmatpush1.bf16.msra.mxu0 %v3734_v11  ;;  %v3830_v11 = vld [vmem:[%s4841_s6 + $0x78] sm:$0xff]  }
  0xf5   : > { %1669 = vmatpush1.bf16.msra.mxu1 %v3737_v12  ;;  %1629 = vmatprep.subr.bf16.mxu0 %v3742_v13  ;;  %v3831_v12 = vld [vmem:[%s4842_s7 + $0x78] sm:$0xff]  }
  0xf6   : > { %1670 = vmatprep.subr.bf16.mxu1 %v3745_v14  ;;  %1659 = vmatprep.mubr.bf16.mxu0 %v4529_v50  ;;  %v3799_v50 = vld [vmem:[#allocation14 + $0x1d4] ss:$8 sps:$4 sm:$0xff]  }
  0xf7   : > { %1700 = vmatprep.mubr.bf16.mxu1 %v776_v53  ;;  %v3802_v53 = vld [vmem:[#allocation14 + $0xc4] ss:$8 sps:$4 sm:$0xff]   ;;  %v3832_v13 = vld [vmem:[%s4841_s6 + $0x38] sm:$0xff]  }
  0xf8   : > { %1630 = vmatpush1.bf16.msra.mxu0 %v3740_v15  ;;  %v3833_v14 = vld [vmem:[%s4842_s7 + $0x38] sm:$0xff]   ;;  %v3836_v15 = vld [vmem:[%s4841_s6 + $0x30] sm:$0xff]  }
  0xf9   : > { %1671 = vmatpush1.bf16.msra.mxu1 %v3743_v16  ;;  %1631 = vmatprep.subr.bf16.mxu0 %v3748_v17  ;;  %v3837_v16 = vld [vmem:[%s4842_s7 + $0x30] sm:$0xff]   ;;  %v3838_v17 = vld [vmem:[%s4841_s6 + $0x68] sm:$0xff]  }
  0xfa   : > { %1672 = vmatprep.subr.bf16.mxu1 %v3751_v18  ;;  %v3839_v18 = vld [vmem:[%s4842_s7 + $0x68] sm:$0xff]  }
  0xfc   : > { %1632 = vmatpush1.bf16.msra.mxu0 %v3746_v19  ;;  %v3840_v19 = vld [vmem:[%s4841_s6 + $0x28] sm:$0xff]  }
  0xfd   : > { %1673 = vmatpush1.bf16.msra.mxu1 %v3749_v20  ;;  %1633 = vmatprep.subr.bf16.mxu0 %v3754_v21  ;;  %v3841_v20 = vld [vmem:[%s4842_s7 + $0x28] sm:$0xff]   ;;  %v3842_v21 = vld [vmem:[%s4841_s6 + $0x60] sm:$0xff]  }
  0xfe   : > { %1674 = vmatprep.subr.bf16.mxu1 %v3757_v22  ;;  %v3843_v22 = vld [vmem:[%s4842_s7 + $0x60] sm:$0xff]  }
 0x100   : > { %1634 = vmatpush1.bf16.msra.mxu0 %v3752_v23  ;;  %v3844_v23 = vld [vmem:[%s4841_s6 + $0x20] sm:$0xff]  }
 0x101   : > { %1675 = vmatpush1.bf16.msra.mxu1 %v3755_v24  ;;  %1635 = vmatprep.subr.bf16.mxu0 %v3760_v25  ;;  %v3845_v24 = vld [vmem:[%s4842_s7 + $0x20] sm:$0xff]   ;;  %v3846_v25 = vld [vmem:[%s4841_s6 + $0x58] sm:$0xff]  }
 0x102   : > { %1676 = vmatprep.subr.bf16.mxu1 %v3763_v26  ;;  %v3847_v26 = vld [vmem:[%s4842_s7 + $0x58] sm:$0xff]  }
 0x104   : > { %1636 = vmatpush1.bf16.msra.mxu0 %v3758_v27  ;;  %v3848_v27 = vld [vmem:[%s4841_s6 + $0x18] sm:$0xff]  }
 0x105   : > { %1677 = vmatpush1.bf16.msra.mxu1 %v3761_v28  ;;  %1637 = vmatprep.subr.bf16.mxu0 %v3766_v29  ;;  %v3849_v28 = vld [vmem:[%s4842_s7 + $0x18] sm:$0xff]   ;;  %v3850_v29 = vld [vmem:[%s4841_s6 + $0x50] sm:$0xff]  }
 0x106   : > { %1678 = vmatprep.subr.bf16.mxu1 %v3769_v30  ;;  %v3851_v30 = vld [vmem:[%s4842_s7 + $0x50] sm:$0xff]  }
 0x108   : > { %1638 = vmatpush1.bf16.msra.mxu0 %v3764_v31  ;;  %v3852_v31 = vld [vmem:[%s4841_s6 + $0x10] sm:$0xff]  }
 0x109   : > { %1679 = vmatpush1.bf16.msra.mxu1 %v3767_v32  ;;  %1639 = vmatprep.subr.bf16.mxu0 %v3772_v33  ;;  %v3853_v32 = vld [vmem:[%s4842_s7 + $0x10] sm:$0xff]   ;;  %v3854_v33 = vld [vmem:[%s4841_s6 + $0x48] sm:$0xff]  }
 0x10a   : > { %1680 = vmatprep.subr.bf16.mxu1 %v3775_v34  ;;  %v3855_v34 = vld [vmem:[%s4842_s7 + $0x48] sm:$0xff]  }
 0x10c   : > { %1640 = vmatpush1.bf16.msra.mxu0 %v3770_v35  ;;  %v3856_v35 = vld [vmem:[%s4841_s6 + $0x8] sm:$0xff]  }
 0x10d   : > { %1681 = vmatpush1.bf16.msra.mxu1 %v3773_v36  ;;  %1641 = vmatprep.subr.bf16.mxu0 %v3778_v37  ;;  %v3857_v36 = vld [vmem:[%s4842_s7 + $0x8] sm:$0xff]   ;;  %v3858_v37 = vld [vmem:[%s4841_s6 + $0x40] sm:$0xff]  }
 0x10e   : > { %1682 = vmatprep.subr.bf16.mxu1 %v3781_v38  ;;  %v3859_v38 = vld [vmem:[%s4842_s7 + $0x40] sm:$0xff]  }
 0x110   : > { %1642 = vmatpush1.bf16.msra.mxu0 %v3776_v39  ;;  %v3860_v39 = vld [vmem:[%s4841_s6] sm:$0xff]  }
 0x111   : > { %1683 = vmatpush1.bf16.msra.mxu1 %v3779_v40  ;;  %1643 = vmatprep.subr.bf16.mxu0 %v3784_v41  ;;  %v3861_v40 = vld [vmem:[%s4842_s7] sm:$0xff]   ;;  %v4217_v41 = vmov 0.0  }
 0x112   : > { %1684 = vmatprep.subr.bf16.mxu1 %v3787_v42  ;;  %2547 = vst.msk [vmem:[#allocation3] sm:$0xff] %vm2334_vm1, %v4217_v41  ;;  %2548 = vst.msk [vmem:[#allocation4] sm:$0xff] %vm2334_vm1, %v4217_v41 }
 0x113   : > { %2549 = vst.msk [vmem:[#allocation5] sm:$0xff] %vm2334_vm1, %v4217_v41  ;;  %2550 = vst.msk [vmem:[#allocation6] sm:$0xff] %vm2334_vm1, %v4217_v41 }
 0x114   : > { %1644 = vmatpush2.bf16.msra.mxu0 %v3782_v43 }
 0x115   : > { %1685 = vmatpush2.bf16.msra.mxu1 %v3785_v44  ;;  %1645 = vmatprep.subr.bf16.mxu0 %v3790_v45 }
 0x116   : > { %1686 = vmatprep.subr.bf16.mxu1 %v3793_v46 }
 0x118   : > { %1646 = vmatpush2.bf16.msra.mxu0 %v3788_v47 }
 0x119   : > { %1687 = vmatpush2.bf16.msra.mxu1 %v3791_v48  ;;  %1647 = vmatprep.subr.bf16.mxu0 %v3796_v49 }
 0x11a   : > { %1688 = vmatprep.subr.bf16.mxu1 %v3799_v50 }
 0x11c   : > { %1648 = vmatpush2.bf16.msra.mxu0 %v3794_v51 }
 0x11d   : > { %1689 = vmatpush2.bf16.msra.mxu1 %v3797_v52  ;;  %1649 = vmatprep.subr.bf16.mxu0 %v3802_v53  ;;  %v1713_v52 = vlaneseq }
 0x11e   : > { %1690 = vmatprep.subr.bf16.mxu1 %v3805_v54 }
 0x11f   : > { %v4642_v53 = vshrl.u32 %v1713_v52, 7 }
 0x120   : > { %1650 = vmatpush2.bf16.msra.mxu0 %v3800_v55  ;;  %v1711_v55 = vld [vmem:[#allocation15] sm:$0x3] }
 0x121   : > { %1691 = vmatpush2.bf16.msra.mxu1 %v3803_v56  ;;  %1651 = vmatprep.subr.bf16.mxu0 %v3808_v57  ;;  %v4645_v54 = vsub.s32 0, %v4642_v53  ;;  %v4648_v56 = vsub.s32 1, %v4642_v53 }
 0x122   : > { %1692 = vmatprep.subr.bf16.mxu1 %v3811_v58 }
 0x124   : > { %1652 = vmatpush2.bf16.msra.mxu0 %v3806_v59 }
 0x125   : > { %1693 = vmatpush2.bf16.msra.mxu1 %v3809_v60  ;;  %1653 = vmatprep.subr.bf16.mxu0 %v3814_v61  ;;  %v1716_v60 = vrot.slane %v1711_v55, %v4645_v54 }
 0x126   : > { %1694 = vmatprep.subr.bf16.mxu1 %v3817_v62 }
 0x128   : > { %1654 = vmatpush2.bf16.msra.mxu0 %v3812_v63 }
 0x129   : > { %1695 = vmatpush2.bf16.msra.mxu1 %v3815_v0  ;;  %1655 = vmatprep.subr.bf16.mxu0 %v3820_v1  ;;  %v1720_v1 = vrot.slane %v1711_v55, %v4648_v56  ;;  %v3353_v55 = vld [vmem:[#allocation17] ss:$0 sm:$0xff] }
 0x12a   : > { %1696 = vmatprep.subr.bf16.mxu1 %v3823_v2 }
 0x12c   : > { %1656 = vmatpush2.bf16.msra.mxu0 %v3818_v3 }
 0x12d   : > { %1697 = vmatpush2.bf16.msra.mxu1 %v3821_v4  ;;  %1657 = vmatprep.subr.bf16.mxu0 %v3826_v5 }
 0x12e   : > { %1698 = vmatprep.subr.bf16.mxu1 %v3829_v6 }
 0x130   : > { %1658 = vmatpush2.bf16.msra.mxu0 %v3824_v7 }
 0x131   : > { %1699 = vmatpush2.bf16.msra.mxu1 %v3827_v8  ;;  %3388 = vmatprep.subr.bf16.mxu0 %v3830_v11 }
 0x132   : > { %3410 = vmatprep.subr.bf16.mxu1 %v3831_v12 }
 0x133   : > { %1660 = vmatmul.mubr.bf16.vlgmr.msra.gmra.mxu0 %v4535_v9  ;;  %v3834_v9 = vld [vmem:[%s4841_s6 + $0x70] sm:$0xff]  }
 0x134   : > { %1701 = vmatmul.mubr.bf16.vlgmr.msra.gmra.mxu1 %v4537_v10  ;;  %v3835_v10 = vld [vmem:[%s4842_s7 + $0x70] sm:$0xff]   ;;  %3389 = vmatpush3.bf16.msra.mxu0 %v3832_v13 }
 0x135   : > { %3411 = vmatpush3.bf16.msra.mxu1 %v3833_v14  ;;  %3390 = vmatprep.subr.bf16.mxu0 %v3834_v9  ;;  %v3862_v14 = vld [vmem:[%s4844_s9 + $0x38] sm:$0xff]  }
 0x136   : > { %3412 = vmatprep.subr.bf16.mxu1 %v3835_v10  ;;  %v3863_v9 = vld [vmem:[%s4845_s10 + $0x38] sm:$0xff]  }
 0x138   : > { %3391 = vmatpush3.bf16.msra.mxu0 %v3836_v15  ;;  %v3864_v15 = vld [vmem:[%s4844_s9 + $0x30] sm:$0xff]  }
 0x139   : > { %3413 = vmatpush3.bf16.msra.mxu1 %v3837_v16  ;;  %3392 = vmatprep.subr.bf16.mxu0 %v3838_v17  ;;  %v3865_v16 = vld [vmem:[%s4845_s10 + $0x30] sm:$0xff]   ;;  %v3866_v17 = vld [vmem:[%s4844_s9 + $0x28] sm:$0xff]  }
 0x13a   : > { %3414 = vmatprep.subr.bf16.mxu1 %v3839_v18  ;;  %v3867_v18 = vld [vmem:[%s4845_s10 + $0x28] sm:$0xff]  }
 0x13c   : > { %3393 = vmatpush3.bf16.msra.mxu0 %v3840_v19  ;;  %v3868_v19 = vld [vmem:[%s4844_s9 + $0x20] sm:$0xff]  }
 0x13d   : > { %3415 = vmatpush3.bf16.msra.mxu1 %v3841_v20  ;;  %3394 = vmatprep.subr.bf16.mxu0 %v3842_v21  ;;  %v3869_v20 = vld [vmem:[%s4845_s10 + $0x20] sm:$0xff]   ;;  %v3870_v21 = vld [vmem:[%s4844_s9 + $0x18] sm:$0xff]  }
 0x13e   : > { %3416 = vmatprep.subr.bf16.mxu1 %v3843_v22  ;;  %v3871_v22 = vld [vmem:[%s4845_s10 + $0x18] sm:$0xff]  }
 0x140   : > { %3395 = vmatpush3.bf16.msra.mxu0 %v3844_v23  ;;  %v3872_v23 = vld [vmem:[%s4844_s9 + $0x10] sm:$0xff]  }
 0x141   : > { %3417 = vmatpush3.bf16.msra.mxu1 %v3845_v24  ;;  %3396 = vmatprep.subr.bf16.mxu0 %v3846_v25  ;;  %v3873_v24 = vld [vmem:[%s4845_s10 + $0x10] sm:$0xff]   ;;  %v3874_v25 = vld [vmem:[%s4844_s9 + $0x8] sm:$0xff]  }
 0x142   : > { %3418 = vmatprep.subr.bf16.mxu1 %v3847_v26  ;;  %v3875_v26 = vld [vmem:[%s4845_s10 + $0x8] sm:$0xff]  }
 0x144   : > { %3397 = vmatpush3.bf16.msra.mxu0 %v3848_v27  ;;  %v3876_v27 = vld [vmem:[%s4844_s9] sm:$0xff]  }
 0x145   : > { %3419 = vmatpush3.bf16.msra.mxu1 %v3849_v28  ;;  %3398 = vmatprep.subr.bf16.mxu0 %v3850_v29  ;;  %v3877_v28 = vld [vmem:[%s4845_s10] sm:$0xff]  }
 0x146   : > { %3420 = vmatprep.subr.bf16.mxu1 %v3851_v30 }
 0x148   : > { %3399 = vmatpush3.bf16.msra.mxu0 %v3852_v31 }
 0x149   : > { %3421 = vmatpush3.bf16.msra.mxu1 %v3853_v32  ;;  %3400 = vmatprep.subr.bf16.mxu0 %v3854_v33 }
 0x14a   : > { %3422 = vmatprep.subr.bf16.mxu1 %v3855_v34 }
 0x14c   : > { %3401 = vmatpush3.bf16.msra.mxu0 %v3856_v35  ;;  %v3336_v35 = vld [vmem:[%s4843_s8] ss:$0 sm:$0xff] }
 0x14d   : > { %3423 = vmatpush3.bf16.msra.mxu1 %v3857_v36  ;;  %3402 = vmatprep.subr.bf16.mxu0 %v3858_v37 }
 0x14e   : > { %3424 = vmatprep.subr.bf16.mxu1 %v3859_v38 }
 0x150   : > { %3403 = vmatpush3.bf16.msra.mxu0 %v3860_v39 }
 0x151   : > { %3425 = vmatpush3.bf16.msra.mxu1 %v3861_v40  ;;  %3455 = vmatprep.subr.bf16.mxu0 %v4217_v41 }
 0x152   : > { %3475 = vmatprep.subr.bf16.mxu1 %v4217_v41 }
 0x1b3   : > { %v1195_v42 = vpop.f32.mrf.mxu0 }
 0x1b4   : > { %v1236_v43 = vpop.f32.mrf.mxu1 }
 0x1b5   : > { %v1237_v44 = vadd.f32 %v1236_v43, %v1195_v42  ;;  %v1197_v45 = vpop.f32.mrf.mxu0 }
 0x1b6   : > { %v1238_v46 = vpop.f32.mrf.mxu1 }
 0x1b7   : > { %v1239_v47 = vadd.f32 %v1238_v46, %v1197_v45  ;;  %v1199_v48 = vpop.f32.mrf.mxu0  ;;  %v3879_v46 = vld [vmem:[%s4847_s12 + $0x10] sm:$0xff]  }
 0x1b8   : > { %v1240_v49 = vpop.f32.mrf.mxu1  ;;  %v3881_v48 = vld [vmem:[%s4847_s12] sm:$0xff]  }
 0x1b9   : > { %v1200_v50 = vpop.f32.mrf.mxu0  ;;  %v3882_v49 = vld [vmem:[#allocation18 + $0x20] ss:$16 sps:$4 sm:$0xff]  }
 0x1ba   : > { %v1241_v51 = vpop.f32.mrf.mxu1  ;;  %v3884_v50 = vld [vmem:[#allocation18 + $0x24] ss:$16 sps:$4 sm:$0xff]  }
 0x1f3   : > { %v1661_v57 = vpop.f32.mrf.mxu0 }
 0x1f4   : > { %v1702_v58 = vpop.f32.mrf.mxu1 }
 0x1f5   : > { %v1703_v59 = vadd.f32 %v1702_v58, %v1661_v57  ;;  %v1663_v61 = vpop.f32.mrf.mxu0 }
 0x1f6   : > { %v1704_v62 = vpop.f32.mrf.mxu1 }
 0x1f7   : > { %v1709_v63 = vmax.f32 %v1237_v44, %v1703_v59  ;;  %v1705_v0 = vadd.f32 %v1704_v62, %v1663_v61  ;;  %v1665_v2 = vpop.f32.mrf.mxu0  ;;  %v3878_v44 = vld [vmem:[%s4847_s12 + $0x18] sm:$0xff]  }
 0x1f8   : > { %v1706_v3 = vpop.f32.mrf.mxu1 }
 0x1f9   : > { %v1723_v4 = vadd.f32 %v1716_v60, %v1709_v63  ;;  %v1710_v5 = vmax.f32 %v1239_v47, %v1705_v0  ;;  %v1666_v6 = vpop.f32.mrf.mxu0  ;;  %v3880_v47 = vld [vmem:[%s4847_s12 + $0x8] sm:$0xff]  }
 0x1fa   : > { %v1707_v7 = vpop.f32.mrf.mxu1  ;;  %v3885_v3 = vld [vmem:[#allocation18] ss:$16 sps:$4 sm:$0xff]  }
 0x1fb   : > { %v1724_v8 = vadd.f32 %v1720_v1, %v1710_v5  ;;  %v1725_v11 = vmax.f32 %v1723_v4, 0.0  ;;  %v3890_v4 = vld [vmem:[#allocation18 + $0x2c] ss:$16 sps:$4 sm:$0xff]   ;;  %v4219_v5 = vmov 0   ;;  %v3354_v7 = vld [vmem:[%s4898_s3] ss:$0 sm:$0xff] }
 0x1fc   : > { %3637 = vset.pattern.permute.xlu0 %v4219_v5  ;;  %v2541_v6 = vld [vmem:[%s763_s26] sm:$0xff] }
 0x1fd   : > { %v1726_v12 = vmax.f32 %v1724_v8, 0.0  ;;  %v1727_v10 = vpack.c.bf16 %v1725_v11, %v1725_v11  ;;  %2544 = vperm.xlu0 %3637, %v2541_v6  }
 0x1ff   : > { %v1728_v13 = vpack.c.bf16 %v1726_v12, %v1726_v12 }
 0x201   : > { %1889 = vmatprep.mubr.bf16.mxu0 %v1728_v13  ;;  %2057 = vmatprep.mubr.bf16.mxu1 %v1728_v13 }
 0x202   : > { %1890 = vmatmul.mubr.bf16.vlgmr.msra.gmra.mxu0 %v1727_v10  ;;  %2058 = vmatmul.mubr.bf16.vlgmr.msra.gmra.mxu1 %v1727_v10 }
 0x203   : > { %3456 = vmatpush3.bf16.msra.mxu0 %v3862_v14  ;;  %3476 = vmatpush3.bf16.msra.mxu1 %v3863_v9  ;;  %v3888_v9 = vld [vmem:[#allocation18 + $0x28] ss:$16 sps:$4 sm:$0xff]  }
 0x204   : > { %3457 = vmatprep.subr.bf16.mxu0 %v4217_v41  ;;  %3477 = vmatprep.subr.bf16.mxu1 %v4217_v41 }
 0x205   : > { %3471 = vmatprep.mubr.msk.bf16.mxu0 %vm4218_vm0, %v4217_v41  ;;  %3491 = vmatprep.mubr.msk.bf16.mxu1 %vm4218_vm0, %v4217_v41 }
 0x207   : > { %3458 = vmatpush3.bf16.msra.mxu0 %v3864_v15  ;;  %3478 = vmatpush3.bf16.msra.mxu1 %v3865_v16  ;;  %v3893_v15 = vld [vmem:[#allocation18 + $0xc] ss:$16 sps:$4 sm:$0xff]  }
 0x208   : > { %3459 = vmatprep.subr.bf16.mxu0 %v4217_v41  ;;  %3479 = vmatprep.subr.bf16.mxu1 %v4217_v41 }
 0x20b   : > { %3460 = vmatpush3.bf16.msra.mxu0 %v3866_v17  ;;  %3480 = vmatpush3.bf16.msra.mxu1 %v3867_v18  ;;  %v3891_v17 = vld [vmem:[#allocation18 + $0x8] ss:$16 sps:$4 sm:$0xff]  }
 0x20c   : > { %3461 = vmatprep.subr.bf16.mxu0 %v4217_v41  ;;  %3481 = vmatprep.subr.bf16.mxu1 %v4217_v41 }
 0x20f   : > { %3462 = vmatpush3.bf16.msra.mxu0 %v3868_v19  ;;  %3482 = vmatpush3.bf16.msra.mxu1 %v3869_v20  ;;  %v2388_v19 = vld [vmem:[%s4899_s20] sm:$0xf] }
 0x210   : > { %3463 = vmatprep.subr.bf16.mxu0 %v4217_v41  ;;  %3483 = vmatprep.subr.bf16.mxu1 %v4217_v41  ;;  %v2393_v20 = vrot.slane %v2388_v19, %v4645_v54 }
 0x213   : > { %3464 = vmatpush3.bf16.msra.mxu0 %v3870_v21  ;;  %3484 = vmatpush3.bf16.msra.mxu1 %v3871_v22  ;;  %v2397_v21 = vrot.slane %v2388_v19, %v4648_v56 }
 0x214   : > { %3465 = vmatprep.subr.bf16.mxu0 %v4217_v41  ;;  %3485 = vmatprep.subr.bf16.mxu1 %v4217_v41 }
 0x217   : > { %3466 = vmatpush3.bf16.msra.mxu0 %v3872_v23  ;;  %3486 = vmatpush3.bf16.msra.mxu1 %v3873_v24  ;;  %v2400_v24 = vsub.s32 2, %v4642_v53 }
 0x218   : > { %3467 = vmatprep.subr.bf16.mxu0 %v4217_v41  ;;  %3487 = vmatprep.subr.bf16.mxu1 %v4217_v41 }
 0x21b   : > { %3468 = vmatpush3.bf16.msra.mxu0 %v3874_v25  ;;  %3488 = vmatpush3.bf16.msra.mxu1 %v3875_v26 }
 0x21c   : > { %3469 = vmatprep.subr.bf16.mxu0 %v4217_v41  ;;  %3489 = vmatprep.subr.bf16.mxu1 %v4217_v41 }
 0x21f   : > { %3470 = vmatpush3.bf16.msra.mxu0 %v3876_v27  ;;  %3490 = vmatpush3.bf16.msra.mxu1 %v3877_v28  ;;  %v2404_v27 = vsub.s32 3, %v4642_v53 }
 0x220   : > { %3495 = vmatprep.subr.bf16.mxu0 %v4217_v41  ;;  %2466 = vmatprep.subr.bf16.mxu1 %v3884_v50 }
 0x278   : > { %v4761_v18 = vpop.permute.xlu0 %2544 }
 0x2c2   : > { %v3404_v29 = vpop.f32.mrf.mxu0  ;;  %v3426_v30 = vpop.f32.mrf.mxu1 }
 0x2c4   : > { %v3405_v31 = vpop.f32.mrf.mxu0  ;;  %v3427_v32 = vpop.f32.mrf.mxu1 }
 0x2c5   : > { %v3406_v33 = vadd.f32 %v3405_v31, %v3404_v29  ;;  %v3428_v34 = vadd.f32 %v3427_v32, %v3426_v30  ;;  %v2401_v29 = vrot.slane %v2388_v19, %v2400_v24  ;;  %v2405_v31 = vrot.slane %v2388_v19, %v2404_v27 }
 0x2c6   : > { %v3407_v36 = vpop.f32.mrf.mxu0  ;;  %v3429_v37 = vpop.f32.mrf.mxu1 }
 0x2c7   : > { %v2065_v38 = vmax.f32 %v3406_v33, %v3428_v34 }
 0x2c8   : > { %v3408_v39 = vpop.f32.mrf.mxu0  ;;  %v3430_v40 = vpop.f32.mrf.mxu1 }
 0x2c9   : > { %v2073_v42 = vadd.f32 %v3336_v35, %v2065_v38 }
 0x2cb   : > { %v2074_v43 = vmax.f32 %v2073_v42, 0.0 }
 0x2cd   : > { %v2075_v45 = vpack.c.bf16 %v2074_v43, %v2074_v43 }
 0x2cf   : > { %3472 = vmatmul.mubr.bf16.vlgmr.msra.gmra.mxu0 %v2075_v45  ;;  %3492 = vmatmul.mubr.bf16.vlgmr.msra.gmra.mxu1 %v2075_v45 }
 0x2d0   : > { %3496 = vmatpush3.bf16.msra.mxu0 %v3878_v44  ;;  %3503 = vmatprep.mubr.msk.bf16.mxu0 %vm4218_vm0, %v4217_v41 }
 0x2d1   : > { %3497 = vmatprep.subr.bf16.mxu0 %v4217_v41  ;;  %2467 = vmatpush1.bf16.msra.mxu1 %v3882_v49 }
 0x2d2   : > { %2486 = vmatprep.mubr.bf16.mxu1 %v4219_v5 }
 0x2d4   : > { %3498 = vmatpush3.bf16.msra.mxu0 %v3879_v46 }
 0x2d5   : > { %3499 = vmatprep.subr.bf16.mxu0 %v4217_v41 }
 0x2d8   : > { %3500 = vmatpush3.bf16.msra.mxu0 %v3880_v47 }
 0x2d9   : > { %3501 = vmatprep.subr.bf16.mxu0 %v4217_v41  ;;  %v3887_v41 = vld [vmem:[#allocation18 + $0x4] ss:$16 sps:$4 sm:$0xff]  }
 0x2da   : > { %2468 = vmatprep.subr.bf16.mxu1 %v3887_v41 }
 0x2db   : > { %2469 = vmatpush1.bf16.msra.mxu1 %v3885_v3 }
 0x2dc   : > { %3502 = vmatpush3.bf16.msra.mxu0 %v3881_v48  ;;  %2507 = vmatprep.subr.bf16.mxu1 %v3890_v4 }
 0x38f   : > { %v2174_v51 = vpop.f32.mrf.mxu0  ;;  %v2278_v52 = vpop.f32.mrf.mxu1 }
 0x390   : > { %v2284_v57 = vmax.f32 %v2174_v51, %v2278_v52 }
 0x391   : > { %v3473_v58 = vpop.f32.mrf.mxu0  ;;  %v3493_v59 = vpop.f32.mrf.mxu1 }
 0x392   : > { %v2292_v60 = vadd.f32 %v3353_v55, %v2284_v57 }
 0x393   : > { %v2177_v61 = vpop.f32.mrf.mxu0  ;;  %v2281_v62 = vpop.f32.mrf.mxu1 }
 0x394   : > { %v2293_v63 = vmax.f32 %v2292_v60, 0.0 }
 0x395   : > { %v3474_v0 = vpop.f32.mrf.mxu0  ;;  %v3494_v1 = vpop.f32.mrf.mxu1 }
 0x396   : > { %v2294_v2 = vpack.c.bf16 %v2293_v63, %v2293_v63 }
 0x398   : > { %3504 = vmatmul.mubr.msk.bf16.vlgmr.msra.gmra.mxu0 %vm2334_vm1, %v2294_v2 }
 0x458   : > { %v2372_v8 = vpop.f32.mrf.mxu0 }
 0x459   : > { %v2373_v11 = vadd.f32 %v3354_v7, %v2372_v8 }
 0x45a   : > { %v3505_v12 = vpop.f32.mrf.mxu0 }
 0x45b   : > { %v2378_v13 = vmax.f32 %v2373_v11, 0.0 }
 0x45c   : > { %v2375_v14 = vpop.f32.mrf.mxu0 }
 0x45d   : > { %v2379_v10 = vpack.c.bf16 %v2378_v13, %v2378_v13 }
 0x45e   : > { %v3506_v16 = vpop.f32.mrf.mxu0 }
 0x45f   : > { %3368 = vmatmul.mubr.msk.bf16.vlgmr.msra.gmra.mxu1 %vm2450_vm2, %v2379_v10 }
 0x460   : > { %2508 = vmatpush1.bf16.msra.mxu1 %v3888_v9  ;;  %2527 = vmatprep.mubr.bf16.mxu1 %v4219_v5 }
 0x461   : > { %2509 = vmatprep.subr.bf16.mxu1 %v3893_v15 }
 0x464   : > { %2510 = vmatpush1.bf16.msra.mxu1 %v3891_v17 }
 0x467   : > { %3369 = vmatmul.mubr.msk.bf16.vlgmr.msra.gmra.mxu1 %vm2450_vm2, %v2379_v10 }
 0x51f   : > { %v2488_v22 = vpop.f32.mrf.mxu1 }
 0x520   : > { %v2489_v23 = vadd.f32 %v2488_v22, %v2393_v20 }
 0x521   : > { %v2490_v25 = vpop.f32.mrf.mxu1 }
 0x522   : > { %2536 = vst [vmem:[#allocation2] sm:$0xff] %v2489_v23  ;;  %v2491_v26 = vadd.f32 %v2490_v25, %v2397_v21 }
 0x523   : > { %v2492_v28 = vpop.f32.mrf.mxu1 }
 0x524   : > { %2537 = vst [vmem:[#allocation2 + $0x8] sm:$0xff] %v2491_v26 }
 0x525   : > { %v2493_v30 = vpop.f32.mrf.mxu1 }
 0x527   : > { %v2529_v32 = vpop.f32.mrf.mxu1 }
 0x528   : > { %v2530_v33 = vadd.f32 %v2529_v32, %v2401_v29 }
 0x529   : > { %v2531_v34 = vpop.f32.mrf.mxu1  ;;  %3056 = sbr.rel (%p3384_p12) target bundleno = 2402 (0x962), region = 174 }
 0x52a   : > { %2539 = vst [vmem:[#allocation2 + $0x10] sm:$0xff] %v2530_v33  ;;  %v2532_v35 = vadd.f32 %v2531_v34, %v2405_v31 }
 0x52b   : > { %v2533_v36 = vpop.f32.mrf.mxu1 }
 0x52c   : > { %2540 = vst [vmem:[#allocation2 + $0x18] sm:$0xff] %v2532_v35 }
 0x52d   : > { %v2534_v37 = vpop.f32.mrf.mxu1 }
 0x52e LB: >> { %v2564_v53 = vld [vmem:[#allocation5] sm:$0xff]  ;;  %v2633_v39 = vld [vmem:[#allocation20 + $0x1f8] sm:$0xff]  ;;  %s4220_s28 = smov 64   ;;  %v2630_v40 = vld [vmem:[#allocation20 + $0x1e0] sm:$0xff]  ;;  %s3387_s11 = sshll.u32 %s4200_s18, 4  ;;  %s4200_s18 = sphi %s4771_s18, %s2557_s18  }
 0x52f   : >> { %v2631_v38 = vld [vmem:[#allocation20 + $0x1e8] sm:$0xff]  ;;  %2566 = vrot.lane.b32.xlu0 %v2564_v53, %s4220_s28  ;;  %v2632_v42 = vld [vmem:[#allocation20 + $0x1f0] sm:$0xff]  ;;  %2705 = vmatprep.subr.mxu1 %v2633_v39  ;;  %v2629_v44 = vld [vmem:[#allocation20 + $0x1d8] sm:$0xff]  ;;  %s2778_s19 = scalar_lea.vmem [#allocation2], %s3387_s11  ;;  %s2560_s22 = scvt.s32.f32 %s4200_s18 }
 0x530   : >> { %2634 = vmatprep.subr.mxu0 %v2631_v38  ;;  %v2627_v43 = vld [vmem:[#allocation20 + $0x1c8] sm:$0xff]  ;;  %v2626_v45 = vld [vmem:[#allocation20 + $0x1c0] sm:$0xff]  ;;  %v2628_v46 = vld [vmem:[#allocation20 + $0x1d0] sm:$0xff]  ;;  %2706 = vmatpush1.msra.mxu1 %v2632_v42  ;;  %s4900_s23 = sld [smem:[#allocation39_spill]]  ;;  %s2557_s18 = sadd.s32 1, %s4200_s18  }
 0x531   : >> { %2635 = vmatpush1.msra.mxu0 %v2630_v40  ;;  %v2623_v47 = vld [vmem:[#allocation20 + $0x1a8] sm:$0xff]  ;;  %v2625_v48 = vld [vmem:[#allocation20 + $0x1b8] sm:$0xff]  ;;  %v2622_v49 = vld [vmem:[#allocation20 + $0x1a0] sm:$0xff]  ;;  %2707 = vmatprep.subr.mxu1 %v2629_v44  ;;  %p2556_p0 = scmp.ge.s32.totalorder %s2557_s18, %s4526_s14 }
 0x532   : >> { %2636 = vmatprep.subr.mxu0 %v2627_v43  ;;  %v2624_v50 = vld [vmem:[#allocation20 + $0x1b0] sm:$0xff]  ;;  %v2619_v51 = vld [vmem:[#allocation20 + $0x188] sm:$0xff]  ;;  %2708 = vmatpush1.msra.mxu1 %v2628_v46  ;;  %v2621_v52 = vld [vmem:[#allocation20 + $0x198] sm:$0xff]  ;;  %v4221_v43 = vmov 0.0  }
 0x533   : >> { %2637 = vmatpush1.msra.mxu0 %v2626_v45  ;;  %v2618_v55 = vld [vmem:[#allocation20 + $0x180] sm:$0xff]  ;;  %2709 = vmatprep.subr.mxu1 %v2625_v48  ;;  %v2620_v57 = vld [vmem:[#allocation20 + $0x190] sm:$0xff]  ;;  %v2615_v58 = vld [vmem:[#allocation20 + $0x168] sm:$0xff] }
 0x534   : >> { %2638 = vmatprep.subr.mxu0 %v2623_v47  ;;  %2710 = vmatpush1.msra.mxu1 %v2624_v50  ;;  %v2617_v59 = vld [vmem:[#allocation20 + $0x178] sm:$0xff]  ;;  %v2614_v60 = vld [vmem:[#allocation20 + $0x160] sm:$0xff]  ;;  %v2616_v61 = vld [vmem:[#allocation20 + $0x170] sm:$0xff] }
 0x535   : >> { %2639 = vmatpush1.msra.mxu0 %v2622_v49  ;;  %2711 = vmatprep.subr.mxu1 %v2621_v52  ;;  %v2611_v62 = vld [vmem:[#allocation20 + $0x148] sm:$0xff]  ;;  %v2613_v63 = vld [vmem:[#allocation20 + $0x158] sm:$0xff]  ;;  %v2610_v0 = vld [vmem:[#allocation20 + $0x140] sm:$0xff] }
 0x536   : >> { %2640 = vmatprep.subr.mxu0 %v2619_v51  ;;  %2712 = vmatpush1.msra.mxu1 %v2620_v57  ;;  %v2612_v1 = vld [vmem:[#allocation20 + $0x150] sm:$0xff]  ;;  %v2607_v2 = vld [vmem:[#allocation20 + $0x128] sm:$0xff]  ;;  %v2609_v41 = vld [vmem:[#allocation20 + $0x138] sm:$0xff] }
 0x537   : >> { %2641 = vmatpush1.msra.mxu0 %v2618_v55  ;;  %2713 = vmatprep.subr.mxu1 %v2617_v59  ;;  %v2606_v3 = vld [vmem:[#allocation20 + $0x120] sm:$0xff]  ;;  %v2608_v4 = vld [vmem:[#allocation20 + $0x130] sm:$0xff]  ;;  %v2603_v5 = vld [vmem:[#allocation20 + $0x108] sm:$0xff] }
 0x538   : >> { %2642 = vmatprep.subr.mxu0 %v2615_v58  ;;  %2714 = vmatpush1.msra.mxu1 %v2616_v61  ;;  %v2605_v6 = vld [vmem:[#allocation20 + $0x118] sm:$0xff]  ;;  %v2602_v7 = vld [vmem:[#allocation20 + $0x100] sm:$0xff]  ;;  %v2604_v8 = vld [vmem:[#allocation20 + $0x110] sm:$0xff] }
 0x539   : >> { %2643 = vmatpush1.msra.mxu0 %v2614_v60  ;;  %2715 = vmatprep.subr.mxu1 %v2613_v63  ;;  %v2599_v11 = vld [vmem:[#allocation20 + $0xe8] sm:$0xff]  ;;  %v2601_v12 = vld [vmem:[#allocation20 + $0xf8] sm:$0xff]  ;;  %v2598_v13 = vld [vmem:[#allocation20 + $0xe0] sm:$0xff] }
 0x53a   : >> { %2644 = vmatprep.subr.mxu0 %v2611_v62  ;;  %2716 = vmatpush1.msra.mxu1 %v2612_v1  ;;  %v2600_v14 = vld [vmem:[#allocation20 + $0xf0] sm:$0xff]  ;;  %v2595_v9 = vld [vmem:[#allocation20 + $0xc8] sm:$0xff]  ;;  %v2597_v10 = vld [vmem:[#allocation20 + $0xd8] sm:$0xff] }
 0x53b   : >> { %2645 = vmatpush1.msra.mxu0 %v2610_v0  ;;  %2717 = vmatprep.subr.mxu1 %v2609_v41  ;;  %v2594_v15 = vld [vmem:[#allocation20 + $0xc0] sm:$0xff]  ;;  %v2596_v16 = vld [vmem:[#allocation20 + $0xd0] sm:$0xff]  ;;  %v2591_v17 = vld [vmem:[#allocation20 + $0xa8] sm:$0xff] }
 0x53c   : >> { %2646 = vmatprep.subr.mxu0 %v2607_v2  ;;  %2718 = vmatpush1.msra.mxu1 %v2608_v4  ;;  %v2593_v19 = vld [vmem:[#allocation20 + $0xb8] sm:$0xff]  ;;  %v2590_v20 = vld [vmem:[#allocation20 + $0xa0] sm:$0xff]  ;;  %v2592_v21 = vld [vmem:[#allocation20 + $0xb0] sm:$0xff] }
 0x53d   : >> { %2647 = vmatpush1.msra.mxu0 %v2606_v3  ;;  %2719 = vmatprep.subr.mxu1 %v2605_v6  ;;  %v2587_v22 = vld [vmem:[#allocation20 + $0x88] sm:$0xff]  ;;  %v2589_v23 = vld [vmem:[#allocation20 + $0x98] sm:$0xff]  ;;  %v2586_v24 = vld [vmem:[#allocation20 + $0x80] sm:$0xff] }
 0x53e   : >> { %2648 = vmatprep.subr.mxu0 %v2603_v5  ;;  %2720 = vmatpush1.msra.mxu1 %v2604_v8  ;;  %v2588_v25 = vld [vmem:[#allocation20 + $0x90] sm:$0xff]  ;;  %v2583_v26 = vld [vmem:[#allocation20 + $0x68] sm:$0xff]  ;;  %v2585_v27 = vld [vmem:[#allocation20 + $0x78] sm:$0xff] }
 0x53f   : >> { %2649 = vmatpush1.msra.mxu0 %v2602_v7  ;;  %2721 = vmatprep.subr.mxu1 %v2601_v12  ;;  %v2582_v28 = vld [vmem:[#allocation20 + $0x60] sm:$0xff]  ;;  %v2584_v29 = vld [vmem:[#allocation20 + $0x70] sm:$0xff]  ;;  %v2579_v30 = vld [vmem:[#allocation20 + $0x48] sm:$0xff] }
 0x540   : >> { %2650 = vmatprep.subr.mxu0 %v2599_v11  ;;  %2722 = vmatpush1.msra.mxu1 %v2600_v14  ;;  %v2581_v31 = vld [vmem:[#allocation20 + $0x58] sm:$0xff]  ;;  %v2578_v32 = vld [vmem:[#allocation20 + $0x40] sm:$0xff]  ;;  %v2580_v33 = vld [vmem:[#allocation20 + $0x50] sm:$0xff] }
 0x541   : >> { %2651 = vmatpush1.msra.mxu0 %v2598_v13  ;;  %2723 = vmatprep.subr.mxu1 %v2597_v10  ;;  %v2575_v34 = vld [vmem:[#allocation20 + $0x28] sm:$0xff]  ;;  %v2577_v35 = vld [vmem:[#allocation20 + $0x38] sm:$0xff]  ;;  %v2574_v36 = vld [vmem:[#allocation20 + $0x20] sm:$0xff] }
 0x542   : >> { %2652 = vmatprep.subr.mxu0 %v2595_v9  ;;  %2724 = vmatpush1.msra.mxu1 %v2596_v16  ;;  %v2576_v37 = vld [vmem:[#allocation20 + $0x30] sm:$0xff]  ;;  %v2571_v53 = vld [vmem:[#allocation20 + $0x8] sm:$0xff]  ;;  %v2573_v38 = vld [vmem:[#allocation20 + $0x18] sm:$0xff] }
 0x543   : >> { %2653 = vmatpush1.msra.mxu0 %v2594_v15  ;;  %2725 = vmatprep.subr.mxu1 %v2593_v19  ;;  %v2570_v39 = vld [vmem:[#allocation20] sm:$0xff]  ;;  %v2572_v40 = vld [vmem:[#allocation20 + $0x10] sm:$0xff]  ;;  %v2841_v62 = vld [vmem:[#allocation21 + $0x78] sm:$0xff] }
 0x544   : >> { %2654 = vmatprep.subr.mxu0 %v2591_v17  ;;  %2726 = vmatpush1.msra.mxu1 %v2592_v21  ;;  %v2783_v42 = vld [vmem:[#allocation4] sm:$0xff]  ;;  %v2563_v44 = vld [vmem:[#allocation3] sm:$0xff]  ;;  %v2840_v63 = vld [vmem:[#allocation21 + $0x70] sm:$0xff] }
 0x545   : >> { %2655 = vmatpush1.msra.mxu0 %v2590_v20  ;;  %2727 = vmatprep.subr.mxu1 %v2589_v23  ;;  %v2779_v47 = vld [vmem:[%s2778_s19] sm:$0xff]  ;;  %v2780_v52 = vld [vmem:[%s2778_s19 + $0x8] sm:$0xff]  ;;  %v2836_v41 = vld [vmem:[#allocation21 + $0x50] sm:$0xff]  ;;  %v2561_v23 = vstv %s2560_s22 }
 0x546   : >> { %2656 = vmatprep.subr.mxu0 %v2587_v22  ;;  %2728 = vmatpush1.msra.mxu1 %v2588_v25  ;;  %v2839_v0 = vld [vmem:[#allocation21 + $0x68] sm:$0xff]  ;;  %v2838_v1 = vld [vmem:[#allocation21 + $0x60] sm:$0xff]  ;;  %v2837_v2 = vld [vmem:[#allocation21 + $0x58] sm:$0xff]  ;;  %vm2562_vm3 = vcmp.gt.f32.partialorder %v4761_v18, %v2561_v23 }
 0x547   : >> { %2657 = vmatpush1.msra.mxu0 %v2586_v24  ;;  %2729 = vmatprep.subr.mxu1 %v2585_v27  ;;  %v2835_v3 = vld [vmem:[#allocation21 + $0x48] sm:$0xff]  ;;  %v2834_v4 = vld [vmem:[#allocation21 + $0x40] sm:$0xff]  ;;  %v2833_v5 = vld [vmem:[#allocation21 + $0x38] sm:$0xff] }
 0x548   : >> { %2658 = vmatprep.subr.mxu0 %v2583_v26  ;;  %2730 = vmatpush1.msra.mxu1 %v2584_v29  ;;  %v2832_v6 = vld [vmem:[#allocation21 + $0x30] sm:$0xff]  ;;  %v2831_v7 = vld [vmem:[#allocation21 + $0x28] sm:$0xff]  ;;  %v2830_v8 = vld [vmem:[#allocation21 + $0x20] sm:$0xff] }
 0x549   : >> { %2659 = vmatpush1.msra.mxu0 %v2582_v28  ;;  %2731 = vmatprep.subr.mxu1 %v2581_v31  ;;  %v2829_v11 = vld [vmem:[#allocation21 + $0x18] sm:$0xff]  ;;  %v2828_v12 = vld [vmem:[#allocation21 + $0x10] sm:$0xff]  ;;  %v2827_v13 = vld [vmem:[#allocation21 + $0x8] sm:$0xff] }
 0x54a   : >> { %2660 = vmatprep.subr.mxu0 %v2579_v30  ;;  %2732 = vmatpush1.msra.mxu1 %v2580_v33  ;;  %v2826_v14 = vld [vmem:[#allocation21] sm:$0xff]  ;;  %v2929_v21 = vld [vmem:[#allocation6] sm:$0xff]  ;;  %v2915_v29 = vld [vmem:[%s4900_s23] sm:$0x3] }
 0x54b   : >> { %2661 = vmatpush1.msra.mxu0 %v2578_v32  ;;  %2733 = vmatprep.subr.mxu1 %v2577_v35  ;;  %v2920_v30 = vrot.slane %v2915_v29, %v4645_v54 }
 0x54c   : >> { %2662 = vmatprep.subr.mxu0 %v2575_v34  ;;  %2734 = vmatpush1.msra.mxu1 %v2576_v37 }
 0x54d   : >> { %2663 = vmatpush1.msra.mxu0 %v2574_v36  ;;  %2735 = vmatprep.subr.mxu1 %v2573_v38  ;;  %v2924_v38 = vrot.slane %v2915_v29, %v4648_v56 }
 0x54e   : >> { %2664 = vmatprep.subr.mxu0 %v2571_v53  ;;  %2698 = vmatprep.mubr.f32.mxu0 %v4221_v43 }
 0x54f   : >> { %2665 = vmatpush1.msra.mxu0 %v2570_v39  ;;  %2736 = vmatpush1.msra.mxu1 %v2572_v40 }
 0x550   : >> { %2769 = vmatprep.mubr.f32.mxu1 %v4221_v43  ;;  %2798 = vrot.lane.b32.xlu0 %v2783_v42, %s4220_s28 }
 0x551   : >> { %2860 = vmatprep.subr.mxu0 %v2841_v62 }
 0x5a1   : >> { %v4778_v45 = vpop.permute.xlu0 %2566 }
 0x5a2   : >> { %v2569_v46 = vsel %vm2334_vm1, %v2563_v44, %v4778_v45 }
 0x5a3   : >> { %2699 = vmatmul.mubr.f32.vlgmr.msra.gmra.mxu0 %v2569_v46  ;;  %2770 = vmatmul.mubr.f32.vlgmr.msra.gmra.mxu1 %v2569_v46 }
 0x5a4   : >> { %2908 = vmatprep.mubr.f32.mxu0 %v4221_v43  ;;  %2861 = vmatpush1.msra.mxu0 %v2840_v63 }
 0x5a5   : >> { %2862 = vmatprep.subr.mxu0 %v2839_v0 }
 0x5a6   : >> { %2863 = vmatpush1.msra.mxu0 %v2838_v1 }
 0x5a7   : >> { %2864 = vmatprep.subr.mxu0 %v2837_v2 }
 0x5a8   : >> { %2865 = vmatpush1.msra.mxu0 %v2836_v41 }
 0x5a9   : >> { %2866 = vmatprep.subr.mxu0 %v2835_v3 }
 0x5aa   : >> { %2867 = vmatpush1.msra.mxu0 %v2834_v4 }
 0x5ab   : >> { %2868 = vmatprep.subr.mxu0 %v2833_v5 }
 0x5ac   : >> { %2869 = vmatpush1.msra.mxu0 %v2832_v6 }
 0x5ad   : >> { %2870 = vmatprep.subr.mxu0 %v2831_v7 }
 0x5ae   : >> { %2871 = vmatpush1.msra.mxu0 %v2830_v8 }
 0x5af   : >> { %2872 = vmatprep.subr.mxu0 %v2829_v11 }
 0x5b0   : >> { %2873 = vmatpush1.msra.mxu0 %v2828_v12 }
 0x5b1   : >> { %2874 = vmatprep.subr.mxu0 %v2827_v13 }
 0x5b2   : >> { %2875 = vmatpush1.msra.mxu0 %v2826_v14 }
 0x5c2   : >> { %v2799_v15 = vpop.permute.xlu0 %2798 }
 0x663   : >> { %v2700_v48 = vpop.f32.mrf.mxu0  ;;  %v2771_v31 = vpop.f32.mrf.mxu1 }
 0x664   : >> { %v2781_v49 = vadd.f32 %v2779_v47, %v2700_v48 }
 0x665   : >> { %v2702_v51 = vpop.f32.mrf.mxu0  ;;  %v2773_v37 = vpop.f32.mrf.mxu1 }
 0x666   : >> { %v3373_v50 = vmul.f32 -1.442695, %v2781_v49  ;;  %v2782_v55 = vadd.f32 %v2780_v52, %v2702_v51 }
 0x668   : >> { %3894 = vpow2.f32 %v3373_v50  ;;  %v3374_v9 = vmul.f32 -1.442695, %v2782_v55 }
 0x669   : >> { %3896 = vtanh.f32 %v2782_v55 }
 0x675   : >> { %v3895_v57 = vpop.eup %3894 }
 0x676   : >> { %v2790_v58 = vadd.f32 1.0, %v3895_v57  ;;  %v3897_v59 = vpop.eup %3896 }
 0x678   : >> { %3898 = vrcp.f32 %v2790_v58 }
 0x679   : >> { %3900 = vpow2.f32 %v3374_v9 }
 0x685   : >> { %v3899_v60 = vpop.eup %3898 }
 0x686   : >> { %v2802_v61 = vmul.f32 %v3899_v60, %v3897_v59  ;;  %v3901_v10 = vpop.eup %3900  ;;  %v2801_v17 = vmul.f32 %v3899_v60, %v2799_v15 }
 0x687   : >> { %v2791_v16 = vadd.f32 1.0, %v3901_v10 }
 0x688   : >> { %2804 = vrot.lane.b32.xlu1 %v2802_v61, %s4220_s28 }
 0x689   : >> { %3902 = vrcp.f32 %v2791_v16 }
 0x68c   : >> { %2811 = vrot.lane.b32.xlu1 %v2563_v44, %s4220_s28 }
 0x690   : >> { %2944 = vrot.lane.b32.xlu1 %v2929_v21, %s4220_s28 }
 0x694   : >> { %2964 = vrot.lane.b32.xlu1 %v2929_v21, %s4220_s28 }
 0x696   : >> { %v3903_v22 = vpop.eup %3902 }
 0x6fa   : >> { %v2805_v19 = vpop.permute.xlu1 %2804 }
 0x6fb   : >> { %v2807_v20 = vadd.f32 %v2805_v19, %v2801_v17 }
 0x6fd   : >> { %3904 = vtanh.f32 %v2807_v20  ;;  %v2815_v47 = vsel %vm2562_vm3, %v2807_v20, %v2799_v15 }
 0x6fe   : >> { %v2812_v25 = vpop.permute.xlu1 %2811 }
 0x702   : >> { %v2945_v50 = vpop.permute.xlu1 %2944 }
 0x706   : >> { %v2965_v57 = vpop.permute.xlu1 %2964 }
 0x70a   : >> { %v3905_v24 = vpop.eup %3904 }
 0x70b   : >> { %v2809_v26 = vmul.f32 %v3905_v24, %v3903_v22 }
 0x70d   : >> { %v2814_v27 = vsel %vm2562_vm3, %v2809_v26, %v2812_v25 }
 0x70e   : >> { %2817 = vrot.lane.b32.xlu0 %v2814_v27, %s4220_s28 }
 0x780   : >> { %v2818_v28 = vpop.permute.xlu0 %2817 }
 0x781   : >> { %2820 = vst.msk [vmem:[#allocation3] sm:$0xff] %vm2334_vm1, %v2818_v28  ;;  %3375 = vmatmul.mubr.msk.f32.vlgmr.msra.gmra.mxu0 %vm2334_vm1, %v2818_v28 }
 0x841   : >> { %v2910_v32 = vpop.f32.mrf.mxu0 }
 0x842   : >> { %v2911_v33 = vadd.f32 %v2910_v32, %v2771_v31 }
 0x843   : >> { %v2912_v36 = vpop.f32.mrf.mxu0 }
 0x844   : >> { %v2927_v34 = vadd.f32 %v2920_v30, %v2911_v33  ;;  %v2913_v53 = vadd.f32 %v2912_v36, %v2773_v37 }
 0x846   : >> { %v3376_v35 = vmul.f32 -1.442695, %v2927_v34  ;;  %v2928_v39 = vadd.f32 %v2924_v38, %v2913_v53 }
 0x848   : >> { %3906 = vpow2.f32 %v3376_v35  ;;  %v3377_v48 = vmul.f32 -1.442695, %v2928_v39 }
 0x849   : >> { %3908 = vtanh.f32 %v2928_v39 }
 0x855   : >> { %v3907_v40 = vpop.eup %3906 }
 0x856   : >> { %v2936_v42 = vadd.f32 1.0, %v3907_v40  ;;  %v3909_v43 = vpop.eup %3908 }
 0x858   : >> { %3910 = vrcp.f32 %v2936_v42 }
 0x859   : >> { %3912 = vpow2.f32 %v3377_v48 }
 0x865   : >> { %v3911_v44 = vpop.eup %3910 }
 0x866   : >> { %v2948_v46 = vmul.f32 %v3911_v44, %v3909_v43  ;;  %v3913_v49 = vpop.eup %3912  ;;  %v2947_v52 = vmul.f32 %v3911_v44, %v2945_v50 }
 0x867   : >> { %v2937_v51 = vadd.f32 1.0, %v3913_v49 }
 0x868   : >> { %2950 = vrot.lane.b32.xlu0 %v2948_v46, %s4220_s28 }
 0x869   : >> { %3914 = vrcp.f32 %v2937_v51 }
 0x86c   : >> { %2822 = vrot.lane.b32.xlu0 %v2815_v47, %s4220_s28 }
 0x876   : >> { %v3915_v61 = vpop.eup %3914 }
 0x8da   : >> { %v2951_v55 = vpop.permute.xlu0 %2950 }
 0x8db   : >> { %v2953_v58 = vadd.f32 %v2951_v55, %v2947_v52 }
 0x8dd   : >> { %3916 = vtanh.f32 %v2953_v58  ;;  %v2967_v59 = vsel %vm2562_vm3, %v2953_v58, %v2965_v57 }
 0x8de   : >> { %v2823_v60 = vpop.permute.xlu0 %2822  ;;  %2969 = vrot.lane.b32.xlu0 %v2967_v59, %s4220_s28 }
 0x8df   : >> { %2825 = vst.msk [vmem:[#allocation4] sm:$0xff] %vm2334_vm1, %v2823_v60 }
 0x8ea   : >> { %v3917_v62 = vpop.eup %3916 }
 0x8eb   : >> { %v2955_v63 = vmul.f32 %v3917_v62, %v3915_v61 }
 0x8ed   : >> { %v2956_v0 = vsel %vm2562_vm3, %v2955_v63, %v4778_v45 }
 0x8ee   : >> { %2958 = vrot.lane.b32.xlu1 %v2956_v0, %s4220_s28 }
 0x950   : >> { %v2970_v1 = vpop.permute.xlu0 %2969 }
 0x951   : >> { %2972 = vst.msk [vmem:[#allocation6] sm:$0xff] %vm2334_vm1, %v2970_v1 }
 0x95d   : > { %2559 = sbr.rel (!%p2556_p0) target bundleno = 1326 (0x52e), region = 180 }
 0x960   : >> { %v2959_v2 = vpop.permute.xlu1 %2958 }
 0x961   : >> { %2961 = vst.msk [vmem:[#allocation5] sm:$0xff] %vm2334_vm1, %v2959_v2 }
 0x962 PF: > { %s4901_s27 = sld [smem:[#allocation40_spill]]  ;;  %v3379_v5 = vld [vmem:[#allocation9] ss:$0 sm:$0xff]  ;;  %vm2999_vm4 = vcmask 7168  }
 0x968   : > { %v2973_v41 = vld [vmem:[#allocation5] sm:$0xff]  ;;  %v3378_v45 = vld [vmem:[%s4901_s27] ss:$0 sm:$0xff] }
 0x969   : > { %v2981_v3 = vmul.f32 %v3378_v45, %v2973_v41 }
 0x96b   : > { %v2982_v4 = vsel %vm2334_vm1, %v2981_v3, 0.0 }
 0x96c   : > { %2983 = vadd.xlane.f32.xlu0 %v2982_v4 }
 0x9f5   : > { %v2984_v6 = vpop.xlane.xlu0 %2983 }
 0x9f6   : > { %v2992_v7 = vadd.f32 %v3379_v5, %v2984_v6 }
 0x9f8   : > { %v3380_v8 = vmul.f32 -1.442695, %v2992_v7 }
 0x9fa   : > { %3918 = vpow2.f32 %v3380_v8 }
 0xa07   : > { %v3919_v11 = vpop.eup %3918 }
 0xa08   : > { %v2996_v12 = vadd.f32 1.0, %v3919_v11 }
 0xa0a   : > { %3920 = vrcp.f32 %v2996_v12 }
 0xa17   : > { %v3921_v54 = vpop.eup %3920 }
 0xa18   : > { %3000 = vst.msk [vmem:[%s4756_s13] sm:$0xff] %vm2999_vm4, %v3921_v54 }
 0xa19 PF: > { %p41_p2 = scmp.ge.s32.totalorder %s4451_s1, 4   ;;  %s4902_s28 = smov %s4188_s29 }
 0xa1a   : > { %s4903_s29 = smov %s4192_s0  ;;  %s4904_s0 = smov %s4462_s2 }
 0xa1b   : > { %s4905_s15 = smov %s4451_s1  ;;  %43 = sbr.rel (!%p41_p2) target bundleno = 30 (0x1e), region = 191 }
 0xa20   :  { %3020 = vsyncpa [#allocation11], 1 }
 0xa21   :  { %3022 = vsyncpa [#allocation11 + $0x1], 1 }
 0xa22   :  { %3023 = vsyncpa [#allocation13], 1 }
 0xa23   :  { %3024 = vsyncpa [#allocation16], 1 }
 0xa24   :  { %3025 = vsyncpa [#allocation19], 1 }
 0xa25   :  { %3026 = vsyncpa [#allocation22], 1 }

</bundles_post_ra>
